<compile_context>
chip_gen: v5e
topology: v5e:2x2
jax: 0.10.0
libtpu: 0.0.40
codegen_flags: <defaults>
</compile_context>

<pallas_src>
import functools
import math

import jax
import jax.numpy as jnp
from jax.experimental import pallas as pl
from jax.experimental.pallas import tpu as pltpu


# ----------------------------------------------------------------------------
# Exact PyTorch LSTM gate math.  gates: (B, 4H) pre-activations in [i,f,g,o]
# order (bias already added).  One wide sigmoid covers i/f/o; g uses true tanh.
# ----------------------------------------------------------------------------
def _lstm_gates(gates, c_prev, H):
    sg = jax.nn.sigmoid(gates)                 # single wide EUP pass (B, 4H)
    i = sg[:, 0:H]
    f = sg[:, H:2 * H]
    o = sg[:, 3 * H:4 * H]
    g = jnp.tanh(gates[:, 2 * H:3 * H])        # exact cell-candidate tanh
    c_new = f * c_prev + i * g
    h_new = o * jnp.tanh(c_new)
    return h_new, c_new


# ----------------------------------------------------------------------------
# Fused kernel.
#   x_ref    : (T*B, D)  time-major rows (row r = t*B + b)
#   w1ih/w1hh/b1, w2ih/w2hh/b2 : per-layer transposed LSTM weights / summed bias
#   wa1 (H,64), ba1 (1,64), wa2 (1,64), ba2 (1,1)      attention params
#   wf1 (H,H//2), bf1 (1,H//2), wf2 (H//2,3), bf2 (1,3) FC head params
#   out_ref  : (B, output_size)
# ----------------------------------------------------------------------------
def fused_lstm_model_kernel(x_ref,
                            w1ih_ref, w1hh_ref, b1_ref,
                            w2ih_ref, w2hh_ref, b2_ref,
                            wa1_ref, ba1_ref, wa2_ref, ba2_ref,
                            wf1_ref, bf1_ref, wf2_ref, bf2_ref,
                            out_ref, *, B, T):
    H = w1hh_ref.shape[0]
    assert w1hh_ref.shape[1] == 4 * H, "gate width must be 4*H"

    # Hoist every small weight / bias read out of the unrolled time loop.
    w1hh = w1hh_ref[...]                                      # (H, 4H)
    w2ih = w2ih_ref[...]                                      # (H, 4H)
    w2hh = w2hh_ref[...]                                      # (H, 4H)
    b2 = b2_ref[...]                                          # (1, 4H)
    wa1 = wa1_ref[...]                                        # (H, 64)
    ba1 = ba1_ref[...]                                        # (1, 64)
    wa2 = wa2_ref[...]                                        # (1, 64)
    ba2 = ba2_ref[...]                                        # (1, 1)

    # Layer-1 input projection hoisted off the recurrence: one batched matmul
    # over all T*B rows, layer-1 bias folded in.
    xproj = (jnp.dot(x_ref[...], w1ih_ref[...],
                     preferred_element_type=jnp.float32)
             + b1_ref[...])                                   # (T*B, 4H)

    h1 = jnp.zeros((B, H), jnp.float32)
    c1 = jnp.zeros((B, H), jnp.float32)
    h2 = jnp.zeros((B, H), jnp.float32)
    c2 = jnp.zeros((B, H), jnp.float32)

    outs = []      # per-step h2, register-resident (no VMEM scratch roundtrip)
    scores = []    # per-step attention score (B, 1)

    # Statically unrolled recurrence (T small & static): the LLO scheduler sees
    # the whole chain; the attention-score branch per step is off the critical
    # path and fills otherwise-dead cycles.
    for t in range(T):
        g1 = (xproj[t * B:(t + 1) * B, :]
              + jnp.dot(h1, w1hh, preferred_element_type=jnp.float32))
        h1, c1 = _lstm_gates(g1, c1, H)
        # TODO(synk): inter-layer LSTM dropout is training-only; identity here.
        g2 = (jnp.dot(h1, w2ih, preferred_element_type=jnp.float32)
              + jnp.dot(h2, w2hh, preferred_element_type=jnp.float32)
              + b2)
        h2, c2 = _lstm_gates(g2, c2, H)

        # attention score for this timestep: Linear(H,64) -> Tanh -> Linear(64,1)
        e_t = jnp.tanh(jnp.dot(h2, wa1, preferred_element_type=jnp.float32) + ba1)
        s_t = jnp.sum(e_t * wa2, axis=1, keepdims=True) + ba2          # (B, 1)

        outs.append(h2)
        scores.append(s_t)

    # Softmax over time, layout-native: (B, T) with T on the lane axis.
    s_bt = jnp.concatenate(scores, axis=1)                              # (B, T)
    m = jnp.max(s_bt, axis=1, keepdims=True)
    p = jnp.exp(s_bt - m)
    attn = p / jnp.sum(p, axis=1, keepdims=True)                        # (B, T)

    # Context vector: weighted sum over T (T small, static unroll).
    ctx = attn[:, 0:1] * outs[0]
    for t in range(1, T):
        ctx = ctx + attn[:, t:t + 1] * outs[t]                          # (B, H)

    # fc1 -> ReLU (-> dropout == identity at inference) -> fc2
    f1 = jnp.maximum(
        jnp.dot(ctx, wf1_ref[...], preferred_element_type=jnp.float32) + bf1_ref[...],
        0.0)                                                            # (B, H//2)
    out_ref[...] = (jnp.dot(f1, wf2_ref[...], preferred_element_type=jnp.float32)
                    + bf2_ref[...])                                     # (B, out)


def lstm_model_forward(x, kern_params):
    """x: (B, T, input_size) -> (B, output_size). Single fused pallas_call."""
    B, T, D = x.shape
    assert len(kern_params["lstm"]) == 2, "fused kernel is specialized to num_layers=2"
    l1, l2 = kern_params["lstm"]
    hp = kern_params["head"]
    out_size = hp["wf2_t"].shape[1]

    # Free XLA-side transpose: time-major (T*B, D) so the kernel's per-step
    # input slices are contiguous leading-axis rows (and the hoisted input
    # projection is one clean 2-D matmul).
    x_tm = jnp.transpose(x, (1, 0, 2)).reshape(T * B, D)

    vm = pl.BlockSpec(memory_space=pltpu.MemorySpace.VMEM)
    # No grid: the whole problem (~100 KiB) lives in VMEM on every generation;
    # weights are grid-invariant VMEM refs (no pipeline double-buffering).
    return pl.pallas_call(
        functools.partial(fused_lstm_model_kernel, B=B, T=T),
        out_shape=jax.ShapeDtypeStruct((B, out_size), jnp.float32),
        in_specs=[vm] * 15,
        out_specs=vm,
    )(x_tm,
      l1["wih_t"], l1["whh_t"], l1["b"],
      l2["wih_t"], l2["whh_t"], l2["b"],
      hp["wa1_t"], hp["ba1"], hp["wa2"], hp["ba2"],
      hp["wf1_t"], hp["bf1"], hp["wf2_t"], hp["bf2"])


# ----------------------------------------------------------------------------
# Parameter construction (deterministic, xavier_normal weights / zero biases,
# matching LSTMModel._initialize_weights).
# ----------------------------------------------------------------------------
def xavier_normal(key, shape):
    fan_out, fan_in = shape  # torch nn weights are (out_features, in_features)
    std = math.sqrt(2.0 / (fan_in + fan_out))
    return std * jax.random.normal(key, shape, dtype=jnp.float32)


def init_params(key, input_size, hidden_size, num_layers, output_size):
    keys = iter(jax.random.split(key, 4 * num_layers + 8))
    H = hidden_size

    raw = {"lstm": [], "attn": {}, "fc": {}}
    kern = {"lstm": [], "head": {}}

    d_in = input_size
    for _ in range(num_layers):
        wih = xavier_normal(next(keys), (4 * H, d_in))
        whh = xavier_normal(next(keys), (4 * H, H))
        bih = jnp.zeros((4 * H,), jnp.float32)
        bhh = jnp.zeros((4 * H,), jnp.float32)
        raw["lstm"].append((wih, whh, bih, bhh))
        kern["lstm"].append({
            "wih_t": wih.T,                       # (d_in, 4H)
            "whh_t": whh.T,                       # (H, 4H)
            "b": (bih + bhh).reshape(1, 4 * H),   # (1, 4H)
        })
        d_in = H

    wa1 = xavier_normal(next(keys), (64, H)); ba1 = jnp.zeros((64,), jnp.float32)
    wa2 = xavier_normal(next(keys), (1, 64)); ba2 = jnp.zeros((1,), jnp.float32)
    wf1 = xavier_normal(next(keys), (H // 2, H)); bf1 = jnp.zeros((H // 2,), jnp.float32)
    wf2 = xavier_normal(next(keys), (output_size, H // 2)); bf2 = jnp.zeros((output_size,), jnp.float32)

    raw["attn"] = {"wa1": wa1, "ba1": ba1, "wa2": wa2, "ba2": ba2}
    raw["fc"] = {"wf1": wf1, "bf1": bf1, "wf2": wf2, "bf2": bf2}
    kern["head"] = {
        "wa1_t": wa1.T, "ba1": ba1.reshape(1, 64),
        "wa2": wa2, "ba2": ba2.reshape(1, 1),
        "wf1_t": wf1.T, "bf1": bf1.reshape(1, H // 2),
        "wf2_t": wf2.T, "bf2": bf2.reshape(1, output_size),
    }
    return raw, kern


# ----------------------------------------------------------------------------
# Pure-JAX reference mirroring the PyTorch forward (inference mode).
# ----------------------------------------------------------------------------
def reference_forward(x, raw):
    B, T, _ = x.shape
    h_seq = x
    for (wih, whh, bih, bhh) in raw["lstm"]:
        H = whh.shape[1]
        h = jnp.zeros((B, H), jnp.float32)
        c = jnp.zeros((B, H), jnp.float32)
        outs = []
        for t in range(T):
            g = h_seq[:, t] @ wih.T + h @ whh.T + bih + bhh
            i = jax.nn.sigmoid(g[:, :H])
            f = jax.nn.sigmoid(g[:, H:2 * H])
            gg = jnp.tanh(g[:, 2 * H:3 * H])
            o = jax.nn.sigmoid(g[:, 3 * H:])
            c = f * c + i * gg
            h = o * jnp.tanh(c)
            outs.append(h)
        h_seq = jnp.stack(outs, axis=1)
    a = raw["attn"]
    fc = raw["fc"]
    e = jnp.tanh(h_seq @ a["wa1"].T + a["ba1"])
    s = e @ a["wa2"].T + a["ba2"]          # (B, T, 1)
    w = jax.nn.softmax(s, axis=1)
    ctx = jnp.sum(w * h_seq, axis=1)       # (B, H)
    f1 = jax.nn.relu(ctx @ fc["wf1"].T + fc["bf1"])
    return f1 @ fc["wf2"].T + fc["bf2"]


if __name__ == "__main__":
    B, T = 2, 8
    INPUT_SIZE, HIDDEN, NUM_LAYERS, OUTPUT_SIZE = 16, 32, 2, 3

    key = jax.random.PRNGKey(0)
    k_x, k_p = jax.random.split(key)
    x = jax.random.normal(k_x, (B, T, INPUT_SIZE), dtype=jnp.float32)

    raw_params, kern_params = init_params(k_p, INPUT_SIZE, HIDDEN, NUM_LAYERS, OUTPUT_SIZE)

    out = lstm_model_forward(x, kern_params)
    out = jax.block_until_ready(out)

    ref = jax.block_until_ready(reference_forward(x, raw_params))
    assert out.shape == (B, OUTPUT_SIZE), out.shape
    assert jnp.allclose(out, ref, atol=2e-3, rtol=2e-3), (out, ref)

    print("KERNEL_OK")
</pallas_src>

<mosaic_0001>
module attributes {stable_mosaic.version = 11 : i64} {
  func.func @fused_lstm_model_kernel(%arg0: memref<16x16xf32, #tpu.memory_space<vmem>>, %arg1: memref<16x128xf32, #tpu.memory_space<vmem>>, %arg2: memref<32x128xf32, #tpu.memory_space<vmem>>, %arg3: memref<1x128xf32, #tpu.memory_space<vmem>>, %arg4: memref<32x128xf32, #tpu.memory_space<vmem>>, %arg5: memref<32x128xf32, #tpu.memory_space<vmem>>, %arg6: memref<1x128xf32, #tpu.memory_space<vmem>>, %arg7: memref<32x64xf32, #tpu.memory_space<vmem>>, %arg8: memref<1x64xf32, #tpu.memory_space<vmem>>, %arg9: memref<1x64xf32, #tpu.memory_space<vmem>>, %arg10: memref<1x1xf32, #tpu.memory_space<vmem>>, %arg11: memref<32x16xf32, #tpu.memory_space<vmem>>, %arg12: memref<1x16xf32, #tpu.memory_space<vmem>>, %arg13: memref<16x3xf32, #tpu.memory_space<vmem>>, %arg14: memref<1x3xf32, #tpu.memory_space<vmem>>, %arg15: memref<2x3xf32, #tpu.memory_space<vmem>>) attributes {dimension_semantics = [], scalar_prefetch = 0 : i64, scratch_operands = 0 : i64, tpu.core_type = #tpu.core_type<tc>} {
    %c0 = arith.constant 0 : index
    %c0_0 = arith.constant 0 : index
    %0 = vector.load %arg2[%c0, %c0_0] : memref<32x128xf32, #tpu.memory_space<vmem>>, vector<32x128xf32>
    %c0_1 = arith.constant 0 : index
    %c0_2 = arith.constant 0 : index
    %1 = vector.load %arg4[%c0_1, %c0_2] : memref<32x128xf32, #tpu.memory_space<vmem>>, vector<32x128xf32>
    %c0_3 = arith.constant 0 : index
    %c0_4 = arith.constant 0 : index
    %2 = vector.load %arg5[%c0_3, %c0_4] : memref<32x128xf32, #tpu.memory_space<vmem>>, vector<32x128xf32>
    %c0_5 = arith.constant 0 : index
    %c0_6 = arith.constant 0 : index
    %3 = vector.load %arg6[%c0_5, %c0_6] : memref<1x128xf32, #tpu.memory_space<vmem>>, vector<1x128xf32>
    %c0_7 = arith.constant 0 : index
    %c0_8 = arith.constant 0 : index
    %4 = vector.load %arg7[%c0_7, %c0_8] : memref<32x64xf32, #tpu.memory_space<vmem>>, vector<32x64xf32>
    %c0_9 = arith.constant 0 : index
    %c0_10 = arith.constant 0 : index
    %5 = vector.load %arg8[%c0_9, %c0_10] : memref<1x64xf32, #tpu.memory_space<vmem>>, vector<1x64xf32>
    %c0_11 = arith.constant 0 : index
    %c0_12 = arith.constant 0 : index
    %6 = vector.load %arg9[%c0_11, %c0_12] : memref<1x64xf32, #tpu.memory_space<vmem>>, vector<1x64xf32>
    %c0_13 = arith.constant 0 : index
    %c0_14 = arith.constant 0 : index
    %7 = vector.load %arg10[%c0_13, %c0_14] : memref<1x1xf32, #tpu.memory_space<vmem>>, vector<1x1xf32>
    %c0_15 = arith.constant 0 : index
    %c0_16 = arith.constant 0 : index
    %8 = vector.load %arg0[%c0_15, %c0_16] : memref<16x16xf32, #tpu.memory_space<vmem>>, vector<16x16xf32>
    %c0_17 = arith.constant 0 : index
    %c0_18 = arith.constant 0 : index
    %9 = vector.load %arg1[%c0_17, %c0_18] : memref<16x128xf32, #tpu.memory_space<vmem>>, vector<16x128xf32>
    %cst = arith.constant dense<0.000000e+00> : vector<16x128xf32>
    %10 = tpu.matmul %8, %9, %cst {dimension_numbers = #tpu.dot_dimension_numbers<[1], [0], [0], [1], [0, 0, 1, 1], [], []>} : vector<16x16xf32>, vector<16x128xf32>, vector<16x128xf32> -> vector<16x128xf32>
    %c0_19 = arith.constant 0 : index
    %c0_20 = arith.constant 0 : index
    %11 = vector.load %arg3[%c0_19, %c0_20] : memref<1x128xf32, #tpu.memory_space<vmem>>, vector<1x128xf32>
    %12 = vector.broadcast %11 : vector<1x128xf32> to vector<16x128xf32>
    %13 = arith.addf %10, %12 : vector<16x128xf32>
    %cst_21 = arith.constant 0.000000e+00 : f32
    %14 = vector.broadcast %cst_21 : f32 to vector<2x32xf32>
    %cst_22 = arith.constant 0.000000e+00 : f32
    %15 = vector.broadcast %cst_22 : f32 to vector<2x32xf32>
    %cst_23 = arith.constant 0.000000e+00 : f32
    %16 = vector.broadcast %cst_23 : f32 to vector<2x32xf32>
    %cst_24 = arith.constant 0.000000e+00 : f32
    %17 = vector.broadcast %cst_24 : f32 to vector<2x32xf32>
    %18 = vector.extract_strided_slice %13 {offsets = [0, 0], sizes = [2, 128], strides = [1, 1]} : vector<16x128xf32> to vector<2x128xf32>
    %cst_25 = arith.constant dense<0.000000e+00> : vector<2x128xf32>
    %19 = tpu.matmul %14, %0, %cst_25 {dimension_numbers = #tpu.dot_dimension_numbers<[1], [0], [0], [1], [0, 0, 1, 1], [], []>} : vector<2x32xf32>, vector<32x128xf32>, vector<2x128xf32> -> vector<2x128xf32>
    %20 = arith.addf %18, %19 : vector<2x128xf32>
    %21 = arith.negf %20 : vector<2x128xf32>
    %22 = math.exp %21 : vector<2x128xf32>
    %cst_26 = arith.constant 1.000000e+00 : f32
    %23 = vector.broadcast %cst_26 : f32 to vector<2x128xf32>
    %24 = arith.addf %23, %22 : vector<2x128xf32>
    %25 = arith.divf %23, %24 : vector<2x128xf32>
    %26 = vector.extract_strided_slice %25 {offsets = [0, 0], sizes = [2, 32], strides = [1, 1]} : vector<2x128xf32> to vector<2x32xf32>
    %27 = vector.extract_strided_slice %25 {offsets = [0, 32], sizes = [2, 32], strides = [1, 1]} : vector<2x128xf32> to vector<2x32xf32>
    %28 = vector.extract_strided_slice %25 {offsets = [0, 96], sizes = [2, 32], strides = [1, 1]} : vector<2x128xf32> to vector<2x32xf32>
    %29 = vector.extract_strided_slice %20 {offsets = [0, 64], sizes = [2, 32], strides = [1, 1]} : vector<2x128xf32> to vector<2x32xf32>
    %30 = math.tanh %29 : vector<2x32xf32>
    %31 = arith.mulf %27, %15 : vector<2x32xf32>
    %32 = arith.mulf %26, %30 : vector<2x32xf32>
    %33 = arith.addf %31, %32 : vector<2x32xf32>
    %34 = math.tanh %33 : vector<2x32xf32>
    %35 = arith.mulf %28, %34 : vector<2x32xf32>
    %cst_27 = arith.constant dense<0.000000e+00> : vector<2x128xf32>
    %36 = tpu.matmul %35, %1, %cst_27 {dimension_numbers = #tpu.dot_dimension_numbers<[1], [0], [0], [1], [0, 0, 1, 1], [], []>} : vector<2x32xf32>, vector<32x128xf32>, vector<2x128xf32> -> vector<2x128xf32>
    %cst_28 = arith.constant dense<0.000000e+00> : vector<2x128xf32>
    %37 = tpu.matmul %16, %2, %cst_28 {dimension_numbers = #tpu.dot_dimension_numbers<[1], [0], [0], [1], [0, 0, 1, 1], [], []>} : vector<2x32xf32>, vector<32x128xf32>, vector<2x128xf32> -> vector<2x128xf32>
    %38 = arith.addf %36, %37 : vector<2x128xf32>
    %39 = vector.broadcast %3 : vector<1x128xf32> to vector<2x128xf32>
    %40 = arith.addf %38, %39 : vector<2x128xf32>
    %41 = arith.negf %40 : vector<2x128xf32>
    %42 = math.exp %41 : vector<2x128xf32>
    %cst_29 = arith.constant 1.000000e+00 : f32
    %43 = vector.broadcast %cst_29 : f32 to vector<2x128xf32>
    %44 = arith.addf %43, %42 : vector<2x128xf32>
    %45 = arith.divf %43, %44 : vector<2x128xf32>
    %46 = vector.extract_strided_slice %45 {offsets = [0, 0], sizes = [2, 32], strides = [1, 1]} : vector<2x128xf32> to vector<2x32xf32>
    %47 = vector.extract_strided_slice %45 {offsets = [0, 32], sizes = [2, 32], strides = [1, 1]} : vector<2x128xf32> to vector<2x32xf32>
    %48 = vector.extract_strided_slice %45 {offsets = [0, 96], sizes = [2, 32], strides = [1, 1]} : vector<2x128xf32> to vector<2x32xf32>
    %49 = vector.extract_strided_slice %40 {offsets = [0, 64], sizes = [2, 32], strides = [1, 1]} : vector<2x128xf32> to vector<2x32xf32>
    %50 = math.tanh %49 : vector<2x32xf32>
    %51 = arith.mulf %47, %17 : vector<2x32xf32>
    %52 = arith.mulf %46, %50 : vector<2x32xf32>
    %53 = arith.addf %51, %52 : vector<2x32xf32>
    %54 = math.tanh %53 : vector<2x32xf32>
    %55 = arith.mulf %48, %54 : vector<2x32xf32>
    %cst_30 = arith.constant dense<0.000000e+00> : vector<2x64xf32>
    %56 = tpu.matmul %55, %4, %cst_30 {dimension_numbers = #tpu.dot_dimension_numbers<[1], [0], [0], [1], [0, 0, 1, 1], [], []>} : vector<2x32xf32>, vector<32x64xf32>, vector<2x64xf32> -> vector<2x64xf32>
    %57 = vector.broadcast %5 : vector<1x64xf32> to vector<2x64xf32>
    %58 = arith.addf %56, %57 : vector<2x64xf32>
    %59 = math.tanh %58 : vector<2x64xf32>
    %60 = vector.broadcast %6 : vector<1x64xf32> to vector<2x64xf32>
    %61 = arith.mulf %59, %60 : vector<2x64xf32>
    %cst_31 = arith.constant dense<0.000000e+00> : vector<2xf32>
    %62 = vector.multi_reduction <add>, %61, %cst_31 [1] : vector<2x64xf32> to vector<2xf32>
    %63 = vector.shape_cast %62 : vector<2xf32> to vector<2x1xf32>
    %64 = vector.broadcast %7 : vector<1x1xf32> to vector<2x1xf32>
    %65 = arith.addf %63, %64 : vector<2x1xf32>
    %66 = vector.extract_strided_slice %13 {offsets = [2, 0], sizes = [2, 128], strides = [1, 1]} : vector<16x128xf32> to vector<2x128xf32>
    %cst_32 = arith.constant dense<0.000000e+00> : vector<2x128xf32>
    %67 = tpu.matmul %35, %0, %cst_32 {dimension_numbers = #tpu.dot_dimension_numbers<[1], [0], [0], [1], [0, 0, 1, 1], [], []>} : vector<2x32xf32>, vector<32x128xf32>, vector<2x128xf32> -> vector<2x128xf32>
    %68 = arith.addf %66, %67 : vector<2x128xf32>
    %69 = arith.negf %68 : vector<2x128xf32>
    %70 = math.exp %69 : vector<2x128xf32>
    %cst_33 = arith.constant 1.000000e+00 : f32
    %71 = vector.broadcast %cst_33 : f32 to vector<2x128xf32>
    %72 = arith.addf %71, %70 : vector<2x128xf32>
    %73 = arith.divf %71, %72 : vector<2x128xf32>
    %74 = vector.extract_strided_slice %73 {offsets = [0, 0], sizes = [2, 32], strides = [1, 1]} : vector<2x128xf32> to vector<2x32xf32>
    %75 = vector.extract_strided_slice %73 {offsets = [0, 32], sizes = [2, 32], strides = [1, 1]} : vector<2x128xf32> to vector<2x32xf32>
    %76 = vector.extract_strided_slice %73 {offsets = [0, 96], sizes = [2, 32], strides = [1, 1]} : vector<2x128xf32> to vector<2x32xf32>
    %77 = vector.extract_strided_slice %68 {offsets = [0, 64], sizes = [2, 32], strides = [1, 1]} : vector<2x128xf32> to vector<2x32xf32>
    %78 = math.tanh %77 : vector<2x32xf32>
    %79 = arith.mulf %75, %33 : vector<2x32xf32>
    %80 = arith.mulf %74, %78 : vector<2x32xf32>
    %81 = arith.addf %79, %80 : vector<2x32xf32>
    %82 = math.tanh %81 : vector<2x32xf32>
    %83 = arith.mulf %76, %82 : vector<2x32xf32>
    %cst_34 = arith.constant dense<0.000000e+00> : vector<2x128xf32>
    %84 = tpu.matmul %83, %1, %cst_34 {dimension_numbers = #tpu.dot_dimension_numbers<[1], [0], [0], [1], [0, 0, 1, 1], [], []>} : vector<2x32xf32>, vector<32x128xf32>, vector<2x128xf32> -> vector<2x128xf32>
    %cst_35 = arith.constant dense<0.000000e+00> : vector<2x128xf32>
    %85 = tpu.matmul %55, %2, %cst_35 {dimension_numbers = #tpu.dot_dimension_numbers<[1], [0], [0], [1], [0, 0, 1, 1], [], []>} : vector<2x32xf32>, vector<32x128xf32>, vector<2x128xf32> -> vector<2x128xf32>
    %86 = arith.addf %84, %85 : vector<2x128xf32>
    %87 = vector.broadcast %3 : vector<1x128xf32> to vector<2x128xf32>
    %88 = arith.addf %86, %87 : vector<2x128xf32>
    %89 = arith.negf %88 : vector<2x128xf32>
    %90 = math.exp %89 : vector<2x128xf32>
    %cst_36 = arith.constant 1.000000e+00 : f32
    %91 = vector.broadcast %cst_36 : f32 to vector<2x128xf32>
    %92 = arith.addf %91, %90 : vector<2x128xf32>
    %93 = arith.divf %91, %92 : vector<2x128xf32>
    %94 = vector.extract_strided_slice %93 {offsets = [0, 0], sizes = [2, 32], strides = [1, 1]} : vector<2x128xf32> to vector<2x32xf32>
    %95 = vector.extract_strided_slice %93 {offsets = [0, 32], sizes = [2, 32], strides = [1, 1]} : vector<2x128xf32> to vector<2x32xf32>
    %96 = vector.extract_strided_slice %93 {offsets = [0, 96], sizes = [2, 32], strides = [1, 1]} : vector<2x128xf32> to vector<2x32xf32>
    %97 = vector.extract_strided_slice %88 {offsets = [0, 64], sizes = [2, 32], strides = [1, 1]} : vector<2x128xf32> to vector<2x32xf32>
    %98 = math.tanh %97 : vector<2x32xf32>
    %99 = arith.mulf %95, %53 : vector<2x32xf32>
    %100 = arith.mulf %94, %98 : vector<2x32xf32>
    %101 = arith.addf %99, %100 : vector<2x32xf32>
    %102 = math.tanh %101 : vector<2x32xf32>
    %103 = arith.mulf %96, %102 : vector<2x32xf32>
    %cst_37 = arith.constant dense<0.000000e+00> : vector<2x64xf32>
    %104 = tpu.matmul %103, %4, %cst_37 {dimension_numbers = #tpu.dot_dimension_numbers<[1], [0], [0], [1], [0, 0, 1, 1], [], []>} : vector<2x32xf32>, vector<32x64xf32>, vector<2x64xf32> -> vector<2x64xf32>
    %105 = vector.broadcast %5 : vector<1x64xf32> to vector<2x64xf32>
    %106 = arith.addf %104, %105 : vector<2x64xf32>
    %107 = math.tanh %106 : vector<2x64xf32>
    %108 = vector.broadcast %6 : vector<1x64xf32> to vector<2x64xf32>
    %109 = arith.mulf %107, %108 : vector<2x64xf32>
    %cst_38 = arith.constant dense<0.000000e+00> : vector<2xf32>
    %110 = vector.multi_reduction <add>, %109, %cst_38 [1] : vector<2x64xf32> to vector<2xf32>
    %111 = vector.shape_cast %110 : vector<2xf32> to vector<2x1xf32>
    %112 = vector.broadcast %7 : vector<1x1xf32> to vector<2x1xf32>
    %113 = arith.addf %111, %112 : vector<2x1xf32>
    %114 = vector.extract_strided_slice %13 {offsets = [4, 0], sizes = [2, 128], strides = [1, 1]} : vector<16x128xf32> to vector<2x128xf32>
    %cst_39 = arith.constant dense<0.000000e+00> : vector<2x128xf32>
    %115 = tpu.matmul %83, %0, %cst_39 {dimension_numbers = #tpu.dot_dimension_numbers<[1], [0], [0], [1], [0, 0, 1, 1], [], []>} : vector<2x32xf32>, vector<32x128xf32>, vector<2x128xf32> -> vector<2x128xf32>
    %116 = arith.addf %114, %115 : vector<2x128xf32>
    %117 = arith.negf %116 : vector<2x128xf32>
    %118 = math.exp %117 : vector<2x128xf32>
    %cst_40 = arith.constant 1.000000e+00 : f32
    %119 = vector.broadcast %cst_40 : f32 to vector<2x128xf32>
    %120 = arith.addf %119, %118 : vector<2x128xf32>
    %121 = arith.divf %119, %120 : vector<2x128xf32>
    %122 = vector.extract_strided_slice %121 {offsets = [0, 0], sizes = [2, 32], strides = [1, 1]} : vector<2x128xf32> to vector<2x32xf32>
    %123 = vector.extract_strided_slice %121 {offsets = [0, 32], sizes = [2, 32], strides = [1, 1]} : vector<2x128xf32> to vector<2x32xf32>
    %124 = vector.extract_strided_slice %121 {offsets = [0, 96], sizes = [2, 32], strides = [1, 1]} : vector<2x128xf32> to vector<2x32xf32>
    %125 = vector.extract_strided_slice %116 {offsets = [0, 64], sizes = [2, 32], strides = [1, 1]} : vector<2x128xf32> to vector<2x32xf32>
    %126 = math.tanh %125 : vector<2x32xf32>
    %127 = arith.mulf %123, %81 : vector<2x32xf32>
    %128 = arith.mulf %122, %126 : vector<2x32xf32>
    %129 = arith.addf %127, %128 : vector<2x32xf32>
    %130 = math.tanh %129 : vector<2x32xf32>
    %131 = arith.mulf %124, %130 : vector<2x32xf32>
    %cst_41 = arith.constant dense<0.000000e+00> : vector<2x128xf32>
    %132 = tpu.matmul %131, %1, %cst_41 {dimension_numbers = #tpu.dot_dimension_numbers<[1], [0], [0], [1], [0, 0, 1, 1], [], []>} : vector<2x32xf32>, vector<32x128xf32>, vector<2x128xf32> -> vector<2x128xf32>
    %cst_42 = arith.constant dense<0.000000e+00> : vector<2x128xf32>
    %133 = tpu.matmul %103, %2, %cst_42 {dimension_numbers = #tpu.dot_dimension_numbers<[1], [0], [0], [1], [0, 0, 1, 1], [], []>} : vector<2x32xf32>, vector<32x128xf32>, vector<2x128xf32> -> vector<2x128xf32>
    %134 = arith.addf %132, %133 : vector<2x128xf32>
    %135 = vector.broadcast %3 : vector<1x128xf32> to vector<2x128xf32>
    %136 = arith.addf %134, %135 : vector<2x128xf32>
    %137 = arith.negf %136 : vector<2x128xf32>
    %138 = math.exp %137 : vector<2x128xf32>
    %cst_43 = arith.constant 1.000000e+00 : f32
    %139 = vector.broadcast %cst_43 : f32 to vector<2x128xf32>
    %140 = arith.addf %139, %138 : vector<2x128xf32>
    %141 = arith.divf %139, %140 : vector<2x128xf32>
    %142 = vector.extract_strided_slice %141 {offsets = [0, 0], sizes = [2, 32], strides = [1, 1]} : vector<2x128xf32> to vector<2x32xf32>
    %143 = vector.extract_strided_slice %141 {offsets = [0, 32], sizes = [2, 32], strides = [1, 1]} : vector<2x128xf32> to vector<2x32xf32>
    %144 = vector.extract_strided_slice %141 {offsets = [0, 96], sizes = [2, 32], strides = [1, 1]} : vector<2x128xf32> to vector<2x32xf32>
    %145 = vector.extract_strided_slice %136 {offsets = [0, 64], sizes = [2, 32], strides = [1, 1]} : vector<2x128xf32> to vector<2x32xf32>
    %146 = math.tanh %145 : vector<2x32xf32>
    %147 = arith.mulf %143, %101 : vector<2x32xf32>
    %148 = arith.mulf %142, %146 : vector<2x32xf32>
    %149 = arith.addf %147, %148 : vector<2x32xf32>
    %150 = math.tanh %149 : vector<2x32xf32>
    %151 = arith.mulf %144, %150 : vector<2x32xf32>
    %cst_44 = arith.constant dense<0.000000e+00> : vector<2x64xf32>
    %152 = tpu.matmul %151, %4, %cst_44 {dimension_numbers = #tpu.dot_dimension_numbers<[1], [0], [0], [1], [0, 0, 1, 1], [], []>} : vector<2x32xf32>, vector<32x64xf32>, vector<2x64xf32> -> vector<2x64xf32>
    %153 = vector.broadcast %5 : vector<1x64xf32> to vector<2x64xf32>
    %154 = arith.addf %152, %153 : vector<2x64xf32>
    %155 = math.tanh %154 : vector<2x64xf32>
    %156 = vector.broadcast %6 : vector<1x64xf32> to vector<2x64xf32>
    %157 = arith.mulf %155, %156 : vector<2x64xf32>
    %cst_45 = arith.constant dense<0.000000e+00> : vector<2xf32>
    %158 = vector.multi_reduction <add>, %157, %cst_45 [1] : vector<2x64xf32> to vector<2xf32>
    %159 = vector.shape_cast %158 : vector<2xf32> to vector<2x1xf32>
    %160 = vector.broadcast %7 : vector<1x1xf32> to vector<2x1xf32>
    %161 = arith.addf %159, %160 : vector<2x1xf32>
    %162 = vector.extract_strided_slice %13 {offsets = [6, 0], sizes = [2, 128], strides = [1, 1]} : vector<16x128xf32> to vector<2x128xf32>
    %cst_46 = arith.constant dense<0.000000e+00> : vector<2x128xf32>
    %163 = tpu.matmul %131, %0, %cst_46 {dimension_numbers = #tpu.dot_dimension_numbers<[1], [0], [0], [1], [0, 0, 1, 1], [], []>} : vector<2x32xf32>, vector<32x128xf32>, vector<2x128xf32> -> vector<2x128xf32>
    %164 = arith.addf %162, %163 : vector<2x128xf32>
    %165 = arith.negf %164 : vector<2x128xf32>
    %166 = math.exp %165 : vector<2x128xf32>
    %cst_47 = arith.constant 1.000000e+00 : f32
    %167 = vector.broadcast %cst_47 : f32 to vector<2x128xf32>
    %168 = arith.addf %167, %166 : vector<2x128xf32>
    %169 = arith.divf %167, %168 : vector<2x128xf32>
    %170 = vector.extract_strided_slice %169 {offsets = [0, 0], sizes = [2, 32], strides = [1, 1]} : vector<2x128xf32> to vector<2x32xf32>
    %171 = vector.extract_strided_slice %169 {offsets = [0, 32], sizes = [2, 32], strides = [1, 1]} : vector<2x128xf32> to vector<2x32xf32>
    %172 = vector.extract_strided_slice %169 {offsets = [0, 96], sizes = [2, 32], strides = [1, 1]} : vector<2x128xf32> to vector<2x32xf32>
    %173 = vector.extract_strided_slice %164 {offsets = [0, 64], sizes = [2, 32], strides = [1, 1]} : vector<2x128xf32> to vector<2x32xf32>
    %174 = math.tanh %173 : vector<2x32xf32>
    %175 = arith.mulf %171, %129 : vector<2x32xf32>
    %176 = arith.mulf %170, %174 : vector<2x32xf32>
    %177 = arith.addf %175, %176 : vector<2x32xf32>
    %178 = math.tanh %177 : vector<2x32xf32>
    %179 = arith.mulf %172, %178 : vector<2x32xf32>
    %cst_48 = arith.constant dense<0.000000e+00> : vector<2x128xf32>
    %180 = tpu.matmul %179, %1, %cst_48 {dimension_numbers = #tpu.dot_dimension_numbers<[1], [0], [0], [1], [0, 0, 1, 1], [], []>} : vector<2x32xf32>, vector<32x128xf32>, vector<2x128xf32> -> vector<2x128xf32>
    %cst_49 = arith.constant dense<0.000000e+00> : vector<2x128xf32>
    %181 = tpu.matmul %151, %2, %cst_49 {dimension_numbers = #tpu.dot_dimension_numbers<[1], [0], [0], [1], [0, 0, 1, 1], [], []>} : vector<2x32xf32>, vector<32x128xf32>, vector<2x128xf32> -> vector<2x128xf32>
    %182 = arith.addf %180, %181 : vector<2x128xf32>
    %183 = vector.broadcast %3 : vector<1x128xf32> to vector<2x128xf32>
    %184 = arith.addf %182, %183 : vector<2x128xf32>
    %185 = arith.negf %184 : vector<2x128xf32>
    %186 = math.exp %185 : vector<2x128xf32>
    %cst_50 = arith.constant 1.000000e+00 : f32
    %187 = vector.broadcast %cst_50 : f32 to vector<2x128xf32>
    %188 = arith.addf %187, %186 : vector<2x128xf32>
    %189 = arith.divf %187, %188 : vector<2x128xf32>
    %190 = vector.extract_strided_slice %189 {offsets = [0, 0], sizes = [2, 32], strides = [1, 1]} : vector<2x128xf32> to vector<2x32xf32>
    %191 = vector.extract_strided_slice %189 {offsets = [0, 32], sizes = [2, 32], strides = [1, 1]} : vector<2x128xf32> to vector<2x32xf32>
    %192 = vector.extract_strided_slice %189 {offsets = [0, 96], sizes = [2, 32], strides = [1, 1]} : vector<2x128xf32> to vector<2x32xf32>
    %193 = vector.extract_strided_slice %184 {offsets = [0, 64], sizes = [2, 32], strides = [1, 1]} : vector<2x128xf32> to vector<2x32xf32>
    %194 = math.tanh %193 : vector<2x32xf32>
    %195 = arith.mulf %191, %149 : vector<2x32xf32>
    %196 = arith.mulf %190, %194 : vector<2x32xf32>
    %197 = arith.addf %195, %196 : vector<2x32xf32>
    %198 = math.tanh %197 : vector<2x32xf32>
    %199 = arith.mulf %192, %198 : vector<2x32xf32>
    %cst_51 = arith.constant dense<0.000000e+00> : vector<2x64xf32>
    %200 = tpu.matmul %199, %4, %cst_51 {dimension_numbers = #tpu.dot_dimension_numbers<[1], [0], [0], [1], [0, 0, 1, 1], [], []>} : vector<2x32xf32>, vector<32x64xf32>, vector<2x64xf32> -> vector<2x64xf32>
    %201 = vector.broadcast %5 : vector<1x64xf32> to vector<2x64xf32>
    %202 = arith.addf %200, %201 : vector<2x64xf32>
    %203 = math.tanh %202 : vector<2x64xf32>
    %204 = vector.broadcast %6 : vector<1x64xf32> to vector<2x64xf32>
    %205 = arith.mulf %203, %204 : vector<2x64xf32>
    %cst_52 = arith.constant dense<0.000000e+00> : vector<2xf32>
    %206 = vector.multi_reduction <add>, %205, %cst_52 [1] : vector<2x64xf32> to vector<2xf32>
    %207 = vector.shape_cast %206 : vector<2xf32> to vector<2x1xf32>
    %208 = vector.broadcast %7 : vector<1x1xf32> to vector<2x1xf32>
    %209 = arith.addf %207, %208 : vector<2x1xf32>
    %210 = vector.extract_strided_slice %13 {offsets = [8, 0], sizes = [2, 128], strides = [1, 1]} : vector<16x128xf32> to vector<2x128xf32>
    %cst_53 = arith.constant dense<0.000000e+00> : vector<2x128xf32>
    %211 = tpu.matmul %179, %0, %cst_53 {dimension_numbers = #tpu.dot_dimension_numbers<[1], [0], [0], [1], [0, 0, 1, 1], [], []>} : vector<2x32xf32>, vector<32x128xf32>, vector<2x128xf32> -> vector<2x128xf32>
    %212 = arith.addf %210, %211 : vector<2x128xf32>
    %213 = arith.negf %212 : vector<2x128xf32>
    %214 = math.exp %213 : vector<2x128xf32>
    %cst_54 = arith.constant 1.000000e+00 : f32
    %215 = vector.broadcast %cst_54 : f32 to vector<2x128xf32>
    %216 = arith.addf %215, %214 : vector<2x128xf32>
    %217 = arith.divf %215, %216 : vector<2x128xf32>
    %218 = vector.extract_strided_slice %217 {offsets = [0, 0], sizes = [2, 32], strides = [1, 1]} : vector<2x128xf32> to vector<2x32xf32>
    %219 = vector.extract_strided_slice %217 {offsets = [0, 32], sizes = [2, 32], strides = [1, 1]} : vector<2x128xf32> to vector<2x32xf32>
    %220 = vector.extract_strided_slice %217 {offsets = [0, 96], sizes = [2, 32], strides = [1, 1]} : vector<2x128xf32> to vector<2x32xf32>
    %221 = vector.extract_strided_slice %212 {offsets = [0, 64], sizes = [2, 32], strides = [1, 1]} : vector<2x128xf32> to vector<2x32xf32>
    %222 = math.tanh %221 : vector<2x32xf32>
    %223 = arith.mulf %219, %177 : vector<2x32xf32>
    %224 = arith.mulf %218, %222 : vector<2x32xf32>
    %225 = arith.addf %223, %224 : vector<2x32xf32>
    %226 = math.tanh %225 : vector<2x32xf32>
    %227 = arith.mulf %220, %226 : vector<2x32xf32>
    %cst_55 = arith.constant dense<0.000000e+00> : vector<2x128xf32>
    %228 = tpu.matmul %227, %1, %cst_55 {dimension_numbers = #tpu.dot_dimension_numbers<[1], [0], [0], [1], [0, 0, 1, 1], [], []>} : vector<2x32xf32>, vector<32x128xf32>, vector<2x128xf32> -> vector<2x128xf32>
    %cst_56 = arith.constant dense<0.000000e+00> : vector<2x128xf32>
    %229 = tpu.matmul %199, %2, %cst_56 {dimension_numbers = #tpu.dot_dimension_numbers<[1], [0], [0], [1], [0, 0, 1, 1], [], []>} : vector<2x32xf32>, vector<32x128xf32>, vector<2x128xf32> -> vector<2x128xf32>
    %230 = arith.addf %228, %229 : vector<2x128xf32>
    %231 = vector.broadcast %3 : vector<1x128xf32> to vector<2x128xf32>
    %232 = arith.addf %230, %231 : vector<2x128xf32>
    %233 = arith.negf %232 : vector<2x128xf32>
    %234 = math.exp %233 : vector<2x128xf32>
    %cst_57 = arith.constant 1.000000e+00 : f32
    %235 = vector.broadcast %cst_57 : f32 to vector<2x128xf32>
    %236 = arith.addf %235, %234 : vector<2x128xf32>
    %237 = arith.divf %235, %236 : vector<2x128xf32>
    %238 = vector.extract_strided_slice %237 {offsets = [0, 0], sizes = [2, 32], strides = [1, 1]} : vector<2x128xf32> to vector<2x32xf32>
    %239 = vector.extract_strided_slice %237 {offsets = [0, 32], sizes = [2, 32], strides = [1, 1]} : vector<2x128xf32> to vector<2x32xf32>
    %240 = vector.extract_strided_slice %237 {offsets = [0, 96], sizes = [2, 32], strides = [1, 1]} : vector<2x128xf32> to vector<2x32xf32>
    %241 = vector.extract_strided_slice %232 {offsets = [0, 64], sizes = [2, 32], strides = [1, 1]} : vector<2x128xf32> to vector<2x32xf32>
    %242 = math.tanh %241 : vector<2x32xf32>
    %243 = arith.mulf %239, %197 : vector<2x32xf32>
    %244 = arith.mulf %238, %242 : vector<2x32xf32>
    %245 = arith.addf %243, %244 : vector<2x32xf32>
    %246 = math.tanh %245 : vector<2x32xf32>
    %247 = arith.mulf %240, %246 : vector<2x32xf32>
    %cst_58 = arith.constant dense<0.000000e+00> : vector<2x64xf32>
    %248 = tpu.matmul %247, %4, %cst_58 {dimension_numbers = #tpu.dot_dimension_numbers<[1], [0], [0], [1], [0, 0, 1, 1], [], []>} : vector<2x32xf32>, vector<32x64xf32>, vector<2x64xf32> -> vector<2x64xf32>
    %249 = vector.broadcast %5 : vector<1x64xf32> to vector<2x64xf32>
    %250 = arith.addf %248, %249 : vector<2x64xf32>
    %251 = math.tanh %250 : vector<2x64xf32>
    %252 = vector.broadcast %6 : vector<1x64xf32> to vector<2x64xf32>
    %253 = arith.mulf %251, %252 : vector<2x64xf32>
    %cst_59 = arith.constant dense<0.000000e+00> : vector<2xf32>
    %254 = vector.multi_reduction <add>, %253, %cst_59 [1] : vector<2x64xf32> to vector<2xf32>
    %255 = vector.shape_cast %254 : vector<2xf32> to vector<2x1xf32>
    %256 = vector.broadcast %7 : vector<1x1xf32> to vector<2x1xf32>
    %257 = arith.addf %255, %256 : vector<2x1xf32>
    %258 = vector.extract_strided_slice %13 {offsets = [10, 0], sizes = [2, 128], strides = [1, 1]} : vector<16x128xf32> to vector<2x128xf32>
    %cst_60 = arith.constant dense<0.000000e+00> : vector<2x128xf32>
    %259 = tpu.matmul %227, %0, %cst_60 {dimension_numbers = #tpu.dot_dimension_numbers<[1], [0], [0], [1], [0, 0, 1, 1], [], []>} : vector<2x32xf32>, vector<32x128xf32>, vector<2x128xf32> -> vector<2x128xf32>
    %260 = arith.addf %258, %259 : vector<2x128xf32>
    %261 = arith.negf %260 : vector<2x128xf32>
    %262 = math.exp %261 : vector<2x128xf32>
    %cst_61 = arith.constant 1.000000e+00 : f32
    %263 = vector.broadcast %cst_61 : f32 to vector<2x128xf32>
    %264 = arith.addf %263, %262 : vector<2x128xf32>
    %265 = arith.divf %263, %264 : vector<2x128xf32>
    %266 = vector.extract_strided_slice %265 {offsets = [0, 0], sizes = [2, 32], strides = [1, 1]} : vector<2x128xf32> to vector<2x32xf32>
    %267 = vector.extract_strided_slice %265 {offsets = [0, 32], sizes = [2, 32], strides = [1, 1]} : vector<2x128xf32> to vector<2x32xf32>
    %268 = vector.extract_strided_slice %265 {offsets = [0, 96], sizes = [2, 32], strides = [1, 1]} : vector<2x128xf32> to vector<2x32xf32>
    %269 = vector.extract_strided_slice %260 {offsets = [0, 64], sizes = [2, 32], strides = [1, 1]} : vector<2x128xf32> to vector<2x32xf32>
    %270 = math.tanh %269 : vector<2x32xf32>
    %271 = arith.mulf %267, %225 : vector<2x32xf32>
    %272 = arith.mulf %266, %270 : vector<2x32xf32>
    %273 = arith.addf %271, %272 : vector<2x32xf32>
    %274 = math.tanh %273 : vector<2x32xf32>
    %275 = arith.mulf %268, %274 : vector<2x32xf32>
    %cst_62 = arith.constant dense<0.000000e+00> : vector<2x128xf32>
    %276 = tpu.matmul %275, %1, %cst_62 {dimension_numbers = #tpu.dot_dimension_numbers<[1], [0], [0], [1], [0, 0, 1, 1], [], []>} : vector<2x32xf32>, vector<32x128xf32>, vector<2x128xf32> -> vector<2x128xf32>
    %cst_63 = arith.constant dense<0.000000e+00> : vector<2x128xf32>
    %277 = tpu.matmul %247, %2, %cst_63 {dimension_numbers = #tpu.dot_dimension_numbers<[1], [0], [0], [1], [0, 0, 1, 1], [], []>} : vector<2x32xf32>, vector<32x128xf32>, vector<2x128xf32> -> vector<2x128xf32>
    %278 = arith.addf %276, %277 : vector<2x128xf32>
    %279 = vector.broadcast %3 : vector<1x128xf32> to vector<2x128xf32>
    %280 = arith.addf %278, %279 : vector<2x128xf32>
    %281 = arith.negf %280 : vector<2x128xf32>
    %282 = math.exp %281 : vector<2x128xf32>
    %cst_64 = arith.constant 1.000000e+00 : f32
    %283 = vector.broadcast %cst_64 : f32 to vector<2x128xf32>
    %284 = arith.addf %283, %282 : vector<2x128xf32>
    %285 = arith.divf %283, %284 : vector<2x128xf32>
    %286 = vector.extract_strided_slice %285 {offsets = [0, 0], sizes = [2, 32], strides = [1, 1]} : vector<2x128xf32> to vector<2x32xf32>
    %287 = vector.extract_strided_slice %285 {offsets = [0, 32], sizes = [2, 32], strides = [1, 1]} : vector<2x128xf32> to vector<2x32xf32>
    %288 = vector.extract_strided_slice %285 {offsets = [0, 96], sizes = [2, 32], strides = [1, 1]} : vector<2x128xf32> to vector<2x32xf32>
    %289 = vector.extract_strided_slice %280 {offsets = [0, 64], sizes = [2, 32], strides = [1, 1]} : vector<2x128xf32> to vector<2x32xf32>
    %290 = math.tanh %289 : vector<2x32xf32>
    %291 = arith.mulf %287, %245 : vector<2x32xf32>
    %292 = arith.mulf %286, %290 : vector<2x32xf32>
    %293 = arith.addf %291, %292 : vector<2x32xf32>
    %294 = math.tanh %293 : vector<2x32xf32>
    %295 = arith.mulf %288, %294 : vector<2x32xf32>
    %cst_65 = arith.constant dense<0.000000e+00> : vector<2x64xf32>
    %296 = tpu.matmul %295, %4, %cst_65 {dimension_numbers = #tpu.dot_dimension_numbers<[1], [0], [0], [1], [0, 0, 1, 1], [], []>} : vector<2x32xf32>, vector<32x64xf32>, vector<2x64xf32> -> vector<2x64xf32>
    %297 = vector.broadcast %5 : vector<1x64xf32> to vector<2x64xf32>
    %298 = arith.addf %296, %297 : vector<2x64xf32>
    %299 = math.tanh %298 : vector<2x64xf32>
    %300 = vector.broadcast %6 : vector<1x64xf32> to vector<2x64xf32>
    %301 = arith.mulf %299, %300 : vector<2x64xf32>
    %cst_66 = arith.constant dense<0.000000e+00> : vector<2xf32>
    %302 = vector.multi_reduction <add>, %301, %cst_66 [1] : vector<2x64xf32> to vector<2xf32>
    %303 = vector.shape_cast %302 : vector<2xf32> to vector<2x1xf32>
    %304 = vector.broadcast %7 : vector<1x1xf32> to vector<2x1xf32>
    %305 = arith.addf %303, %304 : vector<2x1xf32>
    %306 = vector.extract_strided_slice %13 {offsets = [12, 0], sizes = [2, 128], strides = [1, 1]} : vector<16x128xf32> to vector<2x128xf32>
    %cst_67 = arith.constant dense<0.000000e+00> : vector<2x128xf32>
    %307 = tpu.matmul %275, %0, %cst_67 {dimension_numbers = #tpu.dot_dimension_numbers<[1], [0], [0], [1], [0, 0, 1, 1], [], []>} : vector<2x32xf32>, vector<32x128xf32>, vector<2x128xf32> -> vector<2x128xf32>
    %308 = arith.addf %306, %307 : vector<2x128xf32>
    %309 = arith.negf %308 : vector<2x128xf32>
    %310 = math.exp %309 : vector<2x128xf32>
    %cst_68 = arith.constant 1.000000e+00 : f32
    %311 = vector.broadcast %cst_68 : f32 to vector<2x128xf32>
    %312 = arith.addf %311, %310 : vector<2x128xf32>
    %313 = arith.divf %311, %312 : vector<2x128xf32>
    %314 = vector.extract_strided_slice %313 {offsets = [0, 0], sizes = [2, 32], strides = [1, 1]} : vector<2x128xf32> to vector<2x32xf32>
    %315 = vector.extract_strided_slice %313 {offsets = [0, 32], sizes = [2, 32], strides = [1, 1]} : vector<2x128xf32> to vector<2x32xf32>
    %316 = vector.extract_strided_slice %313 {offsets = [0, 96], sizes = [2, 32], strides = [1, 1]} : vector<2x128xf32> to vector<2x32xf32>
    %317 = vector.extract_strided_slice %308 {offsets = [0, 64], sizes = [2, 32], strides = [1, 1]} : vector<2x128xf32> to vector<2x32xf32>
    %318 = math.tanh %317 : vector<2x32xf32>
    %319 = arith.mulf %315, %273 : vector<2x32xf32>
    %320 = arith.mulf %314, %318 : vector<2x32xf32>
    %321 = arith.addf %319, %320 : vector<2x32xf32>
    %322 = math.tanh %321 : vector<2x32xf32>
    %323 = arith.mulf %316, %322 : vector<2x32xf32>
    %cst_69 = arith.constant dense<0.000000e+00> : vector<2x128xf32>
    %324 = tpu.matmul %323, %1, %cst_69 {dimension_numbers = #tpu.dot_dimension_numbers<[1], [0], [0], [1], [0, 0, 1, 1], [], []>} : vector<2x32xf32>, vector<32x128xf32>, vector<2x128xf32> -> vector<2x128xf32>
    %cst_70 = arith.constant dense<0.000000e+00> : vector<2x128xf32>
    %325 = tpu.matmul %295, %2, %cst_70 {dimension_numbers = #tpu.dot_dimension_numbers<[1], [0], [0], [1], [0, 0, 1, 1], [], []>} : vector<2x32xf32>, vector<32x128xf32>, vector<2x128xf32> -> vector<2x128xf32>
    %326 = arith.addf %324, %325 : vector<2x128xf32>
    %327 = vector.broadcast %3 : vector<1x128xf32> to vector<2x128xf32>
    %328 = arith.addf %326, %327 : vector<2x128xf32>
    %329 = arith.negf %328 : vector<2x128xf32>
    %330 = math.exp %329 : vector<2x128xf32>
    %cst_71 = arith.constant 1.000000e+00 : f32
    %331 = vector.broadcast %cst_71 : f32 to vector<2x128xf32>
    %332 = arith.addf %331, %330 : vector<2x128xf32>
    %333 = arith.divf %331, %332 : vector<2x128xf32>
    %334 = vector.extract_strided_slice %333 {offsets = [0, 0], sizes = [2, 32], strides = [1, 1]} : vector<2x128xf32> to vector<2x32xf32>
    %335 = vector.extract_strided_slice %333 {offsets = [0, 32], sizes = [2, 32], strides = [1, 1]} : vector<2x128xf32> to vector<2x32xf32>
    %336 = vector.extract_strided_slice %333 {offsets = [0, 96], sizes = [2, 32], strides = [1, 1]} : vector<2x128xf32> to vector<2x32xf32>
    %337 = vector.extract_strided_slice %328 {offsets = [0, 64], sizes = [2, 32], strides = [1, 1]} : vector<2x128xf32> to vector<2x32xf32>
    %338 = math.tanh %337 : vector<2x32xf32>
    %339 = arith.mulf %335, %293 : vector<2x32xf32>
    %340 = arith.mulf %334, %338 : vector<2x32xf32>
    %341 = arith.addf %339, %340 : vector<2x32xf32>
    %342 = math.tanh %341 : vector<2x32xf32>
    %343 = arith.mulf %336, %342 : vector<2x32xf32>
    %cst_72 = arith.constant dense<0.000000e+00> : vector<2x64xf32>
    %344 = tpu.matmul %343, %4, %cst_72 {dimension_numbers = #tpu.dot_dimension_numbers<[1], [0], [0], [1], [0, 0, 1, 1], [], []>} : vector<2x32xf32>, vector<32x64xf32>, vector<2x64xf32> -> vector<2x64xf32>
    %345 = vector.broadcast %5 : vector<1x64xf32> to vector<2x64xf32>
    %346 = arith.addf %344, %345 : vector<2x64xf32>
    %347 = math.tanh %346 : vector<2x64xf32>
    %348 = vector.broadcast %6 : vector<1x64xf32> to vector<2x64xf32>
    %349 = arith.mulf %347, %348 : vector<2x64xf32>
    %cst_73 = arith.constant dense<0.000000e+00> : vector<2xf32>
    %350 = vector.multi_reduction <add>, %349, %cst_73 [1] : vector<2x64xf32> to vector<2xf32>
    %351 = vector.shape_cast %350 : vector<2xf32> to vector<2x1xf32>
    %352 = vector.broadcast %7 : vector<1x1xf32> to vector<2x1xf32>
    %353 = arith.addf %351, %352 : vector<2x1xf32>
    %354 = vector.extract_strided_slice %13 {offsets = [14, 0], sizes = [2, 128], strides = [1, 1]} : vector<16x128xf32> to vector<2x128xf32>
    %cst_74 = arith.constant dense<0.000000e+00> : vector<2x128xf32>
    %355 = tpu.matmul %323, %0, %cst_74 {dimension_numbers = #tpu.dot_dimension_numbers<[1], [0], [0], [1], [0, 0, 1, 1], [], []>} : vector<2x32xf32>, vector<32x128xf32>, vector<2x128xf32> -> vector<2x128xf32>
    %356 = arith.addf %354, %355 : vector<2x128xf32>
    %357 = arith.negf %356 : vector<2x128xf32>
    %358 = math.exp %357 : vector<2x128xf32>
    %cst_75 = arith.constant 1.000000e+00 : f32
    %359 = vector.broadcast %cst_75 : f32 to vector<2x128xf32>
    %360 = arith.addf %359, %358 : vector<2x128xf32>
    %361 = arith.divf %359, %360 : vector<2x128xf32>
    %362 = vector.extract_strided_slice %361 {offsets = [0, 0], sizes = [2, 32], strides = [1, 1]} : vector<2x128xf32> to vector<2x32xf32>
    %363 = vector.extract_strided_slice %361 {offsets = [0, 32], sizes = [2, 32], strides = [1, 1]} : vector<2x128xf32> to vector<2x32xf32>
    %364 = vector.extract_strided_slice %361 {offsets = [0, 96], sizes = [2, 32], strides = [1, 1]} : vector<2x128xf32> to vector<2x32xf32>
    %365 = vector.extract_strided_slice %356 {offsets = [0, 64], sizes = [2, 32], strides = [1, 1]} : vector<2x128xf32> to vector<2x32xf32>
    %366 = math.tanh %365 : vector<2x32xf32>
    %367 = arith.mulf %363, %321 : vector<2x32xf32>
    %368 = arith.mulf %362, %366 : vector<2x32xf32>
    %369 = arith.addf %367, %368 : vector<2x32xf32>
    %370 = math.tanh %369 : vector<2x32xf32>
    %371 = arith.mulf %364, %370 : vector<2x32xf32>
    %cst_76 = arith.constant dense<0.000000e+00> : vector<2x128xf32>
    %372 = tpu.matmul %371, %1, %cst_76 {dimension_numbers = #tpu.dot_dimension_numbers<[1], [0], [0], [1], [0, 0, 1, 1], [], []>} : vector<2x32xf32>, vector<32x128xf32>, vector<2x128xf32> -> vector<2x128xf32>
    %cst_77 = arith.constant dense<0.000000e+00> : vector<2x128xf32>
    %373 = tpu.matmul %343, %2, %cst_77 {dimension_numbers = #tpu.dot_dimension_numbers<[1], [0], [0], [1], [0, 0, 1, 1], [], []>} : vector<2x32xf32>, vector<32x128xf32>, vector<2x128xf32> -> vector<2x128xf32>
    %374 = arith.addf %372, %373 : vector<2x128xf32>
    %375 = vector.broadcast %3 : vector<1x128xf32> to vector<2x128xf32>
    %376 = arith.addf %374, %375 : vector<2x128xf32>
    %377 = arith.negf %376 : vector<2x128xf32>
    %378 = math.exp %377 : vector<2x128xf32>
    %cst_78 = arith.constant 1.000000e+00 : f32
    %379 = vector.broadcast %cst_78 : f32 to vector<2x128xf32>
    %380 = arith.addf %379, %378 : vector<2x128xf32>
    %381 = arith.divf %379, %380 : vector<2x128xf32>
    %382 = vector.extract_strided_slice %381 {offsets = [0, 0], sizes = [2, 32], strides = [1, 1]} : vector<2x128xf32> to vector<2x32xf32>
    %383 = vector.extract_strided_slice %381 {offsets = [0, 32], sizes = [2, 32], strides = [1, 1]} : vector<2x128xf32> to vector<2x32xf32>
    %384 = vector.extract_strided_slice %381 {offsets = [0, 96], sizes = [2, 32], strides = [1, 1]} : vector<2x128xf32> to vector<2x32xf32>
    %385 = vector.extract_strided_slice %376 {offsets = [0, 64], sizes = [2, 32], strides = [1, 1]} : vector<2x128xf32> to vector<2x32xf32>
    %386 = math.tanh %385 : vector<2x32xf32>
    %387 = arith.mulf %383, %341 : vector<2x32xf32>
    %388 = arith.mulf %382, %386 : vector<2x32xf32>
    %389 = arith.addf %387, %388 : vector<2x32xf32>
    %390 = math.tanh %389 : vector<2x32xf32>
    %391 = arith.mulf %384, %390 : vector<2x32xf32>
    %cst_79 = arith.constant dense<0.000000e+00> : vector<2x64xf32>
    %392 = tpu.matmul %391, %4, %cst_79 {dimension_numbers = #tpu.dot_dimension_numbers<[1], [0], [0], [1], [0, 0, 1, 1], [], []>} : vector<2x32xf32>, vector<32x64xf32>, vector<2x64xf32> -> vector<2x64xf32>
    %393 = vector.broadcast %5 : vector<1x64xf32> to vector<2x64xf32>
    %394 = arith.addf %392, %393 : vector<2x64xf32>
    %395 = math.tanh %394 : vector<2x64xf32>
    %396 = vector.broadcast %6 : vector<1x64xf32> to vector<2x64xf32>
    %397 = arith.mulf %395, %396 : vector<2x64xf32>
    %cst_80 = arith.constant dense<0.000000e+00> : vector<2xf32>
    %398 = vector.multi_reduction <add>, %397, %cst_80 [1] : vector<2x64xf32> to vector<2xf32>
    %399 = vector.shape_cast %398 : vector<2xf32> to vector<2x1xf32>
    %400 = vector.broadcast %7 : vector<1x1xf32> to vector<2x1xf32>
    %401 = arith.addf %399, %400 : vector<2x1xf32>
    %402 = tpu.concatenate %65, %113, %161, %209, %257, %305, %353, %401 in 1 : vector<2x1xf32>, vector<2x1xf32>, vector<2x1xf32>, vector<2x1xf32>, vector<2x1xf32>, vector<2x1xf32>, vector<2x1xf32>, vector<2x1xf32> -> vector<2x8xf32>
    %cst_81 = arith.constant dense<0xFF800000> : vector<2xf32>
    %403 = vector.multi_reduction <maximumf>, %402, %cst_81 [1] : vector<2x8xf32> to vector<2xf32>
    %404 = vector.shape_cast %403 : vector<2xf32> to vector<2x1xf32>
    %405 = vector.broadcast %404 : vector<2x1xf32> to vector<2x8xf32>
    %406 = arith.subf %402, %405 : vector<2x8xf32>
    %407 = math.exp %406 : vector<2x8xf32>
    %cst_82 = arith.constant dense<0.000000e+00> : vector<2xf32>
    %408 = vector.multi_reduction <add>, %407, %cst_82 [1] : vector<2x8xf32> to vector<2xf32>
    %409 = vector.shape_cast %408 : vector<2xf32> to vector<2x1xf32>
    %410 = vector.broadcast %409 : vector<2x1xf32> to vector<2x8xf32>
    %411 = arith.divf %407, %410 : vector<2x8xf32>
    %412 = vector.extract_strided_slice %411 {offsets = [0, 0], sizes = [2, 1], strides = [1, 1]} : vector<2x8xf32> to vector<2x1xf32>
    %413 = vector.broadcast %412 : vector<2x1xf32> to vector<2x32xf32>
    %414 = arith.mulf %413, %55 : vector<2x32xf32>
    %415 = vector.extract_strided_slice %411 {offsets = [0, 1], sizes = [2, 1], strides = [1, 1]} : vector<2x8xf32> to vector<2x1xf32>
    %416 = vector.broadcast %415 : vector<2x1xf32> to vector<2x32xf32>
    %417 = arith.mulf %416, %103 : vector<2x32xf32>
    %418 = arith.addf %414, %417 : vector<2x32xf32>
    %419 = vector.extract_strided_slice %411 {offsets = [0, 2], sizes = [2, 1], strides = [1, 1]} : vector<2x8xf32> to vector<2x1xf32>
    %420 = vector.broadcast %419 : vector<2x1xf32> to vector<2x32xf32>
    %421 = arith.mulf %420, %151 : vector<2x32xf32>
    %422 = arith.addf %418, %421 : vector<2x32xf32>
    %423 = vector.extract_strided_slice %411 {offsets = [0, 3], sizes = [2, 1], strides = [1, 1]} : vector<2x8xf32> to vector<2x1xf32>
    %424 = vector.broadcast %423 : vector<2x1xf32> to vector<2x32xf32>
    %425 = arith.mulf %424, %199 : vector<2x32xf32>
    %426 = arith.addf %422, %425 : vector<2x32xf32>
    %427 = vector.extract_strided_slice %411 {offsets = [0, 4], sizes = [2, 1], strides = [1, 1]} : vector<2x8xf32> to vector<2x1xf32>
    %428 = vector.broadcast %427 : vector<2x1xf32> to vector<2x32xf32>
    %429 = arith.mulf %428, %247 : vector<2x32xf32>
    %430 = arith.addf %426, %429 : vector<2x32xf32>
    %431 = vector.extract_strided_slice %411 {offsets = [0, 5], sizes = [2, 1], strides = [1, 1]} : vector<2x8xf32> to vector<2x1xf32>
    %432 = vector.broadcast %431 : vector<2x1xf32> to vector<2x32xf32>
    %433 = arith.mulf %432, %295 : vector<2x32xf32>
    %434 = arith.addf %430, %433 : vector<2x32xf32>
    %435 = vector.extract_strided_slice %411 {offsets = [0, 6], sizes = [2, 1], strides = [1, 1]} : vector<2x8xf32> to vector<2x1xf32>
    %436 = vector.broadcast %435 : vector<2x1xf32> to vector<2x32xf32>
    %437 = arith.mulf %436, %343 : vector<2x32xf32>
    %438 = arith.addf %434, %437 : vector<2x32xf32>
    %439 = vector.extract_strided_slice %411 {offsets = [0, 7], sizes = [2, 1], strides = [1, 1]} : vector<2x8xf32> to vector<2x1xf32>
    %440 = vector.broadcast %439 : vector<2x1xf32> to vector<2x32xf32>
    %441 = arith.mulf %440, %391 : vector<2x32xf32>
    %442 = arith.addf %438, %441 : vector<2x32xf32>
    %c0_83 = arith.constant 0 : index
    %c0_84 = arith.constant 0 : index
    %443 = vector.load %arg11[%c0_83, %c0_84] : memref<32x16xf32, #tpu.memory_space<vmem>>, vector<32x16xf32>
    %cst_85 = arith.constant dense<0.000000e+00> : vector<2x16xf32>
    %444 = tpu.matmul %442, %443, %cst_85 {dimension_numbers = #tpu.dot_dimension_numbers<[1], [0], [0], [1], [0, 0, 1, 1], [], []>} : vector<2x32xf32>, vector<32x16xf32>, vector<2x16xf32> -> vector<2x16xf32>
    %c0_86 = arith.constant 0 : index
    %c0_87 = arith.constant 0 : index
    %445 = vector.load %arg12[%c0_86, %c0_87] : memref<1x16xf32, #tpu.memory_space<vmem>>, vector<1x16xf32>
    %446 = vector.broadcast %445 : vector<1x16xf32> to vector<2x16xf32>
    %447 = arith.addf %444, %446 : vector<2x16xf32>
    %cst_88 = arith.constant 0.000000e+00 : f32
    %448 = vector.broadcast %cst_88 : f32 to vector<2x16xf32>
    %449 = arith.maximumf %447, %448 : vector<2x16xf32>
    %c0_89 = arith.constant 0 : index
    %c0_90 = arith.constant 0 : index
    %450 = vector.load %arg13[%c0_89, %c0_90] : memref<16x3xf32, #tpu.memory_space<vmem>>, vector<16x3xf32>
    %cst_91 = arith.constant dense<0.000000e+00> : vector<2x3xf32>
    %451 = tpu.matmul %449, %450, %cst_91 {dimension_numbers = #tpu.dot_dimension_numbers<[1], [0], [0], [1], [0, 0, 1, 1], [], []>} : vector<2x16xf32>, vector<16x3xf32>, vector<2x3xf32> -> vector<2x3xf32>
    %c0_92 = arith.constant 0 : index
    %c0_93 = arith.constant 0 : index
    %452 = vector.load %arg14[%c0_92, %c0_93] : memref<1x3xf32, #tpu.memory_space<vmem>>, vector<1x3xf32>
    %453 = vector.broadcast %452 : vector<1x3xf32> to vector<2x3xf32>
    %454 = arith.addf %451, %453 : vector<2x3xf32>
    %c0_94 = arith.constant 0 : index
    %c0_95 = arith.constant 0 : index
    %455 = vector.load %arg15[%c0_94, %c0_95] : memref<2x3xf32, #tpu.memory_space<vmem>>, vector<2x3xf32>
    tpu.vector_store %arg15[%c0_94, %c0_95], %454 {strides = array<i32>} : memref<2x3xf32, #tpu.memory_space<vmem>>, vector<2x3xf32>,
    return
  }
}

</mosaic_0001>

<bundles_post_ra>
// kernel: tpu_custom_call.1
= control target key start
LH: loop header
LB: loop body
LE: loop exit
PB: predicated region body
PF: predicated region fallthrough
CT: control target
= control target key end

     0   :  { %s2769_s0 = inlined_call_operand.vmem [shape: f32[16,16], index: 0, kind: input, shape index: {}]   ;;  %s2770_s1 = inlined_call_operand.hbm [shape: f32[16,128], index: 1, kind: input, shape index: {}]   ;;  %s2771_s2 = inlined_call_operand.vmem [shape: f32[32,128], index: 2, kind: input, shape index: {}]   ;;  %s2772_s3 = inlined_call_operand.vmem [shape: f32[1,128], index: 3, kind: input, shape index: {}]   ;;  %s2773_s4 = inlined_call_operand.hbm [shape: f32[32,128], index: 4, kind: input, shape index: {}]   ;;  %s2774_s5 = inlined_call_operand.hbm [shape: f32[32,128], index: 5, kind: input, shape index: {}]   ;;  %s2775_s6 = inlined_call_operand.vmem [shape: f32[1,128], index: 6, kind: input, shape index: {}]   ;;  %s2776_s7 = inlined_call_operand.hbm [shape: f32[32,64], index: 7, kind: input, shape index: {}]   ;;  %s2777_s8 = inlined_call_operand.vmem [shape: f32[1,64], index: 8, kind: input, shape index: {}]   ;;  %s2778_s9 = inlined_call_operand.vmem [shape: f32[1,64], index: 9, kind: input, shape index: {}]   ;;  %s2779_s10 = inlined_call_operand.<no memory space> [shape: f32[1,1], index: 10, kind: input, shape index: {}]   ;;  %s2780_s11 = inlined_call_operand.vmem [shape: f32[32,16], index: 11, kind: input, shape index: {}]   ;;  %s2781_s12 = inlined_call_operand.vmem [shape: f32[1,16], index: 12, kind: input, shape index: {}]   ;;  %s2782_s13 = inlined_call_operand.vmem [shape: f32[16,3], index: 13, kind: input, shape index: {}]   ;;  %s2783_s14 = inlined_call_operand.vmem [shape: f32[1,3], index: 14, kind: input, shape index: {}]   ;;  %s2784_s15 = inlined_call_operand.hbm [shape: f32[2,3], index: 15, kind: output, shape index: {}]  }
   0x1   :  { %v20_v0 = vstv %s2779_s10 }
   0x2   :  { %21 = vst [vmem:[#allocation2] sm:$0x1] %v20_v0 }
   0x3   :  { %22 = vsyncpa [#allocation4], 0 }
   0x4   :  { %23 = vsyncpa [#allocation7], 0 }
   0x5   :  { %24 = vsyncpa [#allocation10], 0 }
   0x6   :  { %25 = vsyncpa [#allocation5], 0  ;;  %s49_s22 = sshll.u32 %s2773_s4, 4  ;;  %s2186_s23 = smov [#allocation6]   ;;  %s50_s22 = int_to_ptr.hbm [resolvable:$true] %s49_s22 }
   0x7   :  { %s51_s24 = sshll.u32 %s2186_s23, 4  ;;  %s32_s27 = sshll.u32 %s2770_s1, 4  ;;  %s52_s24 = int_to_ptr.vmem [resolvable:$true] %s51_s24  ;;  %s33_s27 = int_to_ptr.hbm [resolvable:$true] %s32_s27 }
   0x8   :  { %s2187_s28 = smov 128   ;;  %s2188_s29 = smov 8  }
   0x9   :  { %57 = dma.hbm_to_vmem [thread:$0]  %s50_s22, 512, %s52_s24, [#allocation7], %s2187_s28, %s2187_s28, %s2188_s29  }
   0xa   :  { %s2189_s10 = smov [#allocation3]   ;;  %s62_s18 = sshll.u32 %s2774_s5, 4  ;;  %s63_s18 = int_to_ptr.hbm [resolvable:$true] %s62_s18 }
   0xb   :  { %s34_s30 = sshll.u32 %s2189_s10, 4  ;;  %s77_s20 = sshll.u32 %s2776_s7, 4  ;;  %s35_s30 = int_to_ptr.vmem [resolvable:$true] %s34_s30  ;;  %s78_s20 = int_to_ptr.hbm [resolvable:$true] %s77_s20 }
   0xc   :  { %40 = dma.hbm_to_vmem [thread:$0]  %s33_s27, 256, %s35_s30, [#allocation4], %s2187_s28, %s2187_s28, %s2188_s29  }
   0xd   :  { %s2190_s21 = smov [#allocation8]   ;;  %s2191_s1 = smov [#allocation9]  }
   0xe   :  { %s64_s23 = sshll.u32 %s2190_s21, 4  ;;  %s79_s22 = sshll.u32 %s2191_s1, 4  ;;  %s65_s23 = int_to_ptr.vmem [resolvable:$true] %s64_s23  ;;  %s80_s22 = int_to_ptr.vmem [resolvable:$true] %s79_s22 }
   0xf   :  { %70 = dma.hbm_to_vmem [thread:$0]  %s63_s18, 512, %s65_s23, [#allocation7], %s2187_s28, %s2187_s28, %s2188_s29  }
  0x10   :  { %85 = dma.hbm_to_vmem [thread:$0]  %s78_s20, 512, %s80_s22, [#allocation10], %s2187_s28, %s2187_s28, %s2188_s29  }
  0x11   :  { %2178 = dma.done.wait [#allocation4], 256  }
  0x12   :  { %2179 = vsyncadd [#allocation4], 4294967040 }
  0x13   :  { %2180 = dma.done.wait [#allocation7], 1024  }
  0x14   :  { %2181 = vsyncadd [#allocation7], 4294966272 }
  0x15   :  { %2182 = dma.done.wait [#allocation10], 512  }
  0x16   :  { %2183 = vsyncadd [#allocation10], 4294966784  ;;  %v2309_v1 = vld [vmem:[%s2771_s2 + $0x18] sm:$0xff]  ;;  %v139_v2 = vld [vmem:[#allocation3 + $0x8] sm:$0xff]  ;;  %vm144_vm0 = vcmask 130048   ;;  %v2192_v8 = vmov 0.0  }
  0x17   :  { %v2314_v3 = vld [vmem:[%s2771_s2 + $0x10] sm:$0xff]  ;;  %190 = vmatpush.msra.mxu1 %v2309_v1  ;;  %165 = vmatpush.msra.mxu0 %v139_v2  ;;  %v138_v4 = vld [vmem:[#allocation3] sm:$0xff]  ;;  %v2337_v9 = vld [vmem:[%s2772_s3] ss:$0 sm:$0xff]  ;;  %s2194_s3 = smov 32   ;;  %vm174_vm5 = vcmask 261120  }
  0x18   :  { %v136_v5 = vld [vmem:[%s2769_s0] sm:$0xff]  ;;  %v2323_v6 = vld [vmem:[%s2771_s2 + $0x8] sm:$0xff]  ;;  %v2365_v40 = vld [vmem:[#allocation8] sm:$0xff]  ;;  %s2197_s5 = smov 2   ;;  %s2198_s24 = smov 4  }
  0x19   :  { %v2328_v7 = vld [vmem:[%s2771_s2] sm:$0xff]  ;;  %191 = vmatpush.msra.mxu1 %v2314_v3  ;;  %166 = vmatpush.msra.mxu0 %v138_v4  ;;  %s2193_s2 = smov 64   ;;  %v2349_v34 = vld [vmem:[#allocation8 + $0x18] sm:$0xff]  ;;  %v2370_v41 = vld [vmem:[#allocation6] sm:$0xff]  ;;  %s2199_s7 = smov 3  }
  0x1a   :  { %1811 = vmatmul.msk.f32.vlgmr.msra.gmra.mxu0 %vm144_vm0, %v136_v5  ;;  %v2351_v35 = vld [vmem:[#allocation8 + $0x10] sm:$0xff]  ;;  %248 = vmatpush.msra.mxu2 %v2349_v34  ;;  %v2354_v36 = vld [vmem:[#allocation6 + $0x18] sm:$0xff]  ;;  %v2358_v38 = vld [vmem:[#allocation8 + $0x8] sm:$0xff]  ;;  %s2200_s25 = smov 6   ;;  %s2201_s26 = smov 7  }
  0x1b   :  { %192 = vmatpush.msra.mxu1 %v2323_v6  ;;  %v2356_v37 = vld [vmem:[#allocation6 + $0x10] sm:$0xff]  ;;  %273 = vmatpush.msra.mxu3 %v2354_v36  ;;  %v2363_v39 = vld [vmem:[#allocation6 + $0x8] sm:$0xff] }
  0x1c   :  { %465 = vmatpush.msrb.mxu0 %v2354_v36  ;;  %249 = vmatpush.msra.mxu2 %v2351_v35  ;;  %v2408_v51 = vld [vmem:[%s2775_s6] ss:$0 sm:$0xff] }
  0x1d   :  { %193 = vmatpush.msra.mxu1 %v2328_v7  ;;  %274 = vmatpush.msra.mxu3 %v2356_v37 }
  0x1e   :  { %194 = vmatmul.f32.vlgmr.msra.gmra.mxu1 %v2192_v8  ;;  %466 = vmatpush.msrb.mxu0 %v2356_v37 }
  0x1f   :  { %250 = vmatpush.msra.mxu2 %v2358_v38  ;;  %275 = vmatpush.msra.mxu3 %v2363_v39 }
  0x20   :  { %467 = vmatpush.msrb.mxu0 %v2363_v39 }
  0x21   :  { %251 = vmatpush.msra.mxu2 %v2365_v40  ;;  %276 = vmatpush.msra.mxu3 %v2370_v41 }
  0x22   :  { %252 = vmatmul.f32.vlgmr.msra.gmra.mxu2 %v2192_v8  ;;  %468 = vmatpush.msrb.mxu0 %v2370_v41 }
  0x23   :  { %375 = vmatpush.msrb.mxu2 %v2309_v1  ;;  %439 = vmatpush.msrb.mxu3 %v2349_v34 }
  0x24   :  { %644 = vmatpush.msra.mxu0 %v2354_v36 }
  0x25   :  { %376 = vmatpush.msrb.mxu2 %v2314_v3  ;;  %440 = vmatpush.msrb.mxu3 %v2351_v35 }
  0x26   :  { %645 = vmatpush.msra.mxu0 %v2356_v37 }
  0x27   :  { %377 = vmatpush.msrb.mxu2 %v2323_v6  ;;  %441 = vmatpush.msrb.mxu3 %v2358_v38 }
  0x28   :  { %646 = vmatpush.msra.mxu0 %v2363_v39 }
  0x29   :  { %378 = vmatpush.msrb.mxu2 %v2328_v7  ;;  %442 = vmatpush.msrb.mxu3 %v2365_v40 }
  0x2a   :  { %647 = vmatpush.msra.mxu0 %v2370_v41 }
  0x2b   :  { %554 = vmatpush.msra.mxu2 %v2309_v1 }
  0x2d   :  { %555 = vmatpush.msra.mxu2 %v2314_v3 }
  0x2f   :  { %556 = vmatpush.msra.mxu2 %v2323_v6 }
  0x31   :  { %557 = vmatpush.msra.mxu2 %v2328_v7 }
  0x97   :  { %v168_v10 = vpop.f32.mrf.mxu0 }
  0x98   :  { %v2340_v11 = vadd.f32 %v2337_v9, %v168_v10 }
  0x9b   :  { %v195_v12 = vpop.f32.mrf.mxu1 }
  0x9c   :  { %v198_v13 = vadd.f32 %v195_v12, %v2340_v11 }
  0x9e   :  { %1901 = vtanh.f32 %v198_v13  ;;  %v1813_v15 = vmul.f32 -1.442695, %v198_v13 }
  0xa0   :  { %1903 = vpow2.f32 %v1813_v15 }
  0xa4   :  { %v1902_v14 = vpop.eup %1901 }
  0xa5   :  { %221 = vrot.lane.b32.xlu0 %v1902_v14, %s2193_s2  ;;  %v253_v45 = vpop.f32.mrf.mxu2 }
  0xa6   :  { %v1904_v16 = vpop.eup %1903 }
  0xa7   :  { %v202_v17 = vadd.f32 1.0, %v1904_v16 }
  0xa9   :  { %1905 = vrcp.f32 %v202_v17  ;;  %v214_v23 = vand.u32 2147483648, %v202_v17  ;;  %vm208_vm2 = vweird.f32 %v202_v17  ;;  %v212_v24 = vand.u32 2147483647, %v202_v17 }
  0xab   :  { %v215_v26 = vor.u32 1.1754944e-38, %v214_v23  ;;  %vm213_vm4 = vcmp.eq.f32.partialorder %v212_v24, 8.507059e+37 }
  0xaf   :  { %v1906_v18 = vpop.eup %1905 }
  0xb0   :  { %v204_v19 = vmul.f32 %v1906_v18, %v202_v17  ;;  %vm209_vm1 = vweird.f32 %v1906_v18 }
  0xb1   :  { %vm210_vm3 = vmor %vm208_vm2, %vm209_vm1 }
  0xb2   :  { %v205_v20 = vsub.f32 1.0, %v204_v19 }
  0xb4   :  { %v206_v21 = vmul.f32 %v1906_v18, %v205_v20 }
  0xb6   :  { %v207_v22 = vadd.f32 %v1906_v18, %v206_v21 }
  0xb8   :  { %v211_v25 = vsel %vm210_vm3, %v1906_v18, %v207_v22 }
  0xb9   :  { %v216_v28 = vsel %vm213_vm4, %v215_v26, %v211_v25 }
  0xba   :  { %v219_v30 = vmul.f32 0.0, %v216_v28 }
 0x117   :  { %v222_v27 = vpop.permute.xlu0 %221 }
 0x118   :  { %v224_v29 = vmul.f32 %v222_v27, %v216_v28 }
 0x11a   :  { %226 = vrot.lane.b32.xlu0 %v224_v29, %s2194_s3 }
 0x18c   :  { %v227_v31 = vpop.permute.xlu0 %226 }
 0x18d   :  { %v2345_v32 = vadd.f32 %v227_v31, %v219_v30 }
 0x18f   :  { %1907 = vtanh.f32 %v2345_v32  ;;  %v408_v27 = vrot.slane %v2345_v32, 6 }
 0x195   :  { %v1908_v33 = vpop.eup %1907 }
 0x196   :  { %232 = vrot.lane.b32.xlu1 %v1908_v33, %s2193_s2 }
 0x208   :  { %v233_v42 = vpop.permute.xlu1 %232 }
 0x209   :  { %v235_v43 = vmul.f32 %v233_v42, %v216_v28 }
 0x20b   :  { %257 = vrot.lane.b32.xlu1 %v235_v43, %s2194_s3 }
 0x27d   :  { %v258_v44 = vpop.permute.xlu1 %257 }
 0x27e   :  { %1814 = vmatmul.msk.f32.vlgmr.msra.gmra.mxu3 %vm174_vm5, %v258_v44  ;;  %1817 = vmatmul.msk.f32.vlgmr.msrb.gmra.mxu2 %vm174_vm5, %v258_v44 }
 0x27f   :  { %733 = vmatpush.msrb.mxu2 %v2309_v1  ;;  %618 = vmatpush.msra.mxu3 %v2349_v34 }
 0x281   :  { %734 = vmatpush.msrb.mxu2 %v2314_v3  ;;  %619 = vmatpush.msra.mxu3 %v2351_v35 }
 0x283   :  { %735 = vmatpush.msrb.mxu2 %v2323_v6  ;;  %620 = vmatpush.msra.mxu3 %v2358_v38 }
 0x285   :  { %736 = vmatpush.msrb.mxu2 %v2328_v7  ;;  %621 = vmatpush.msra.mxu3 %v2365_v40 }
 0x301   :  { %v380_v46 = vpop.f32.mrf.mxu2  ;;  %v278_v48 = vpop.f32.mrf.mxu3 }
 0x302   :  { %v384_v47 = vrot.slane %v380_v46, 6  ;;  %v279_v50 = vadd.f32 %v278_v48, %v253_v45  ;;  %v2427_v48 = vld [vmem:[#allocation9 + $0x18] sm:$0xff] }
 0x303   :  { %342 = vmatpush.msrb.mxu1 %v2427_v48 }
 0x304   :  { %v386_v49 = vadd.f32 %v384_v47, %v2340_v11  ;;  %v284_v52 = vadd.f32 %v2408_v51, %v279_v50  ;;  %v137_v47 = vld [vmem:[%s2769_s0 + $0x8] sm:$0xff] }
 0x305   :  { %1812 = vmatmul.msk.f32.gmra.mxu0 %vm144_vm0, %v137_v47 }
 0x306   :  { %1909 = vtanh.f32 %v386_v49  ;;  %v1818_v55 = vmul.f32 -1.442695, %v386_v49  ;;  %v1815_v56 = vmul.f32 -1.442695, %v284_v52 }
 0x307   :  { %1911 = vtanh.f32 %v284_v52  ;;  %v2436_v52 = vld [vmem:[#allocation9 + $0x10] sm:$0xff] }
 0x308   :  { %1913 = vpow2.f32 %v1818_v55  ;;  %343 = vmatpush.msrb.mxu1 %v2436_v52 }
 0x309   :  { %1915 = vpow2.f32 %v1815_v56 }
 0x30c   :  { %v1910_v53 = vpop.eup %1909 }
 0x30d   :  { %412 = vrot.lane.b32.xlu2 %v1910_v53, %s2193_s2  ;;  %v1912_v54 = vpop.eup %1911  ;;  %v2438_v53 = vld [vmem:[#allocation9 + $0x8] sm:$0xff] }
 0x30e   :  { %v1914_v57 = vpop.eup %1913  ;;  %344 = vmatpush.msrb.mxu1 %v2438_v53 }
 0x30f   :  { %v390_v58 = vadd.f32 1.0, %v1914_v57  ;;  %v1916_v59 = vpop.eup %1915 }
 0x310   :  { %v288_v60 = vadd.f32 1.0, %v1916_v59 }
 0x311   :  { %1917 = vrcp.f32 %v390_v58  ;;  %v402_v10 = vand.u32 2147483648, %v390_v58  ;;  %vm396_vm7 = vweird.f32 %v390_v58  ;;  %v400_v12 = vand.u32 2147483647, %v390_v58 }
 0x312   :  { %1919 = vrcp.f32 %v288_v60  ;;  %v300_v20 = vand.u32 2147483648, %v288_v60  ;;  %vm294_vm11 = vweird.f32 %v288_v60  ;;  %v298_v21 = vand.u32 2147483647, %v288_v60 }
 0x313   :  { %v403_v15 = vor.u32 1.1754944e-38, %v402_v10  ;;  %vm401_vm9 = vcmp.eq.f32.partialorder %v400_v12, 8.507059e+37 }
 0x314   :  { %v301_v23 = vor.u32 1.1754944e-38, %v300_v20  ;;  %vm299_vm13 = vcmp.eq.f32.partialorder %v298_v21, 8.507059e+37 }
 0x315   :  { %307 = vrot.lane.b32.xlu2 %v1912_v54, %s2193_s2  ;;  %v2441_v54 = vld [vmem:[#allocation9] sm:$0xff] }
 0x316   :  { %345 = vmatpush.msrb.mxu1 %v2441_v54 }
 0x317   :  { %v1918_v61 = vpop.eup %1917 }
 0x318   :  { %v392_v62 = vmul.f32 %v1918_v61, %v390_v58  ;;  %v1920_v0 = vpop.eup %1919  ;;  %vm397_vm6 = vweird.f32 %v1918_v61  ;;  %528 = vmatpush.msra.mxu1 %v2427_v48 }
 0x319   :  { %v290_v4 = vmul.f32 %v1920_v0, %v288_v60  ;;  %vm398_vm8 = vmor %vm396_vm7, %vm397_vm6  ;;  %vm295_vm10 = vweird.f32 %v1920_v0 }
 0x31a   :  { %v393_v63 = vsub.f32 1.0, %v392_v62  ;;  %vm296_vm12 = vmor %vm294_vm11, %vm295_vm10  ;;  %529 = vmatpush.msra.mxu1 %v2436_v52 }
 0x31b   :  { %v291_v8 = vsub.f32 1.0, %v290_v4 }
 0x31c   :  { %v394_v2 = vmul.f32 %v1918_v61, %v393_v63  ;;  %530 = vmatpush.msra.mxu1 %v2438_v53 }
 0x31d   :  { %v292_v14 = vmul.f32 %v1920_v0, %v291_v8 }
 0x31e   :  { %v395_v5 = vadd.f32 %v1918_v61, %v394_v2  ;;  %531 = vmatpush.msra.mxu1 %v2441_v54 }
 0x31f   :  { %v293_v19 = vadd.f32 %v1920_v0, %v292_v14 }
 0x320   :  { %v399_v13 = vsel %vm398_vm8, %v1918_v61, %v395_v5 }
 0x321   :  { %v404_v17 = vsel %vm401_vm9, %v403_v15, %v399_v13  ;;  %v297_v22 = vsel %vm296_vm12, %v1920_v0, %v293_v19 }
 0x322   :  { %v302_v25 = vsel %vm299_vm13, %v301_v23, %v297_v22  ;;  %v410_v28 = vmul.f32 %v408_v27, %v404_v17 }
 0x323   :  { %v305_v31 = vmul.f32 0.0, %v302_v25 }
 0x367   :  { %v413_v16 = vpop.permute.xlu2 %412 }
 0x368   :  { %v415_v18 = vmul.f32 %v413_v16, %v404_v17 }
 0x36a   :  { %417 = vrot.lane.b32.xlu0 %v415_v18, %s2194_s3 }
 0x36f   :  { %v308_v24 = vpop.permute.xlu2 %307 }
 0x370   :  { %v310_v26 = vmul.f32 %v308_v24, %v302_v25 }
 0x372   :  { %312 = vrot.lane.b32.xlu1 %v310_v26, %s2194_s3 }
 0x382   :  { %v2469_v57 = vpop.f32.mrf.mxu0 }
 0x3dc   :  { %v418_v29 = vpop.permute.xlu0 %417 }
 0x3dd   :  { %v2416_v30 = vadd.f32 %v418_v29, %v410_v28 }
 0x3df   :  { %1921 = vtanh.f32 %v2416_v30 }
 0x3e4   :  { %v313_v33 = vpop.permute.xlu1 %312 }
 0x3e5   :  { %v1922_v42 = vpop.eup %1921  ;;  %v2419_v43 = vadd.f32 %v313_v33, %v305_v31 }
 0x3e6   :  { %423 = vrot.lane.b32.xlu2 %v1922_v42, %s2193_s2 }
 0x3e7   :  { %1923 = vtanh.f32 %v2419_v43 }
 0x3ed   :  { %v1924_v44 = vpop.eup %1923 }
 0x3ee   :  { %318 = vrot.lane.b32.xlu0 %v1924_v44, %s2193_s2 }
 0x440   :  { %v424_v45 = vpop.permute.xlu2 %423 }
 0x441   :  { %v426_v32 = vmul.f32 %v424_v45, %v404_v17 }
 0x443   :  { %v448_v46 = vrot.slane %v426_v32, 2 }
 0x445   :  { %449 = vrot.lane.b32.xlu1 %v448_v46, %s2194_s3 }
 0x460   :  { %v319_v49 = vpop.permute.xlu0 %318 }
 0x461   :  { %v2432_v50 = vmul.f32 %v319_v49, %v302_v25 }
 0x463   :  { %326 = vrot.lane.b32.xlu2 %v2432_v50, %s2194_s3 }
 0x4b7   :  { %v450_v55 = vpop.permute.xlu1 %449 }
 0x4b8   :  { %1820 = vmatmul.msk.f32.vlgmr.msrb.gmra.mxu0 %vm174_vm5, %v450_v55  ;;  %1823 = vmatmul.msk.f32.vlgmr.msra.gmra.mxu2 %vm174_vm5, %v450_v55  ;;  %v587_v55 = vrot.slane %v2416_v30, 6 }
 0x4b9   :  { %912 = vmatpush.msra.mxu2 %v2309_v1  ;;  %823 = vmatpush.msrb.mxu0 %v2354_v36 }
 0x4bb   :  { %913 = vmatpush.msra.mxu2 %v2314_v3  ;;  %824 = vmatpush.msrb.mxu0 %v2356_v37 }
 0x4bd   :  { %v327_v56 = vpop.permute.xlu2 %326  ;;  %914 = vmatpush.msra.mxu2 %v2323_v6  ;;  %825 = vmatpush.msrb.mxu0 %v2363_v39 }
 0x4be   :  { %1816 = vmatmul.msk.f32.vlgmr.msrb.gmra.mxu1 %vm174_vm5, %v327_v56  ;;  %1819 = vmatmul.msk.f32.vlgmr.msrb.gmra.mxu3 %vm174_vm5, %v327_v56 }
 0x4bf   :  { %707 = vmatpush.msrb.mxu1 %v2427_v48  ;;  %797 = vmatpush.msrb.mxu3 %v2349_v34 }
 0x4c0   :  { %915 = vmatpush.msra.mxu2 %v2328_v7  ;;  %826 = vmatpush.msrb.mxu0 %v2370_v41 }
 0x4c1   :  { %708 = vmatpush.msrb.mxu1 %v2436_v52  ;;  %798 = vmatpush.msrb.mxu3 %v2351_v35 }
 0x4c3   :  { %709 = vmatpush.msrb.mxu1 %v2438_v53  ;;  %799 = vmatpush.msrb.mxu3 %v2358_v38 }
 0x4c5   :  { %710 = vmatpush.msrb.mxu1 %v2441_v54  ;;  %800 = vmatpush.msrb.mxu3 %v2365_v40 }
 0x535   :  { %v470_v61 = vpop.f32.mrf.mxu0 }
 0x53b   :  { %v559_v58 = vpop.f32.mrf.mxu2 }
 0x53c   :  { %v563_v59 = vrot.slane %v559_v58, 4 }
 0x53e   :  { %v565_v60 = vadd.f32 %v563_v59, %v2340_v11 }
 0x540   :  { %1925 = vtanh.f32 %v565_v60  ;;  %v1824_v5 = vmul.f32 -1.442695, %v565_v60 }
 0x541   :  { %v444_v62 = vpop.f32.mrf.mxu3 }
 0x542   :  { %v471_v63 = vadd.f32 %v470_v61, %v444_v62 }
 0x544   :  { %v473_v0 = vadd.f32 %v2408_v51, %v471_v63 }
 0x546   :  { %v1926_v2 = vpop.eup %1925  ;;  %1927 = vtanh.f32 %v473_v0  ;;  %v1821_v8 = vmul.f32 -1.442695, %v473_v0 }
 0x547   :  { %591 = vrot.lane.b32.xlu0 %v1926_v2, %s2193_s2  ;;  %1929 = vpow2.f32 %v1824_v5 }
 0x548   :  { %1931 = vpow2.f32 %v1821_v8 }
 0x54c   :  { %v1928_v4 = vpop.eup %1927 }
 0x54d   :  { %496 = vrot.lane.b32.xlu1 %v1928_v4, %s2193_s2  ;;  %v1930_v10 = vpop.eup %1929 }
 0x54e   :  { %v569_v12 = vadd.f32 1.0, %v1930_v10  ;;  %v1932_v13 = vpop.eup %1931 }
 0x54f   :  { %v477_v14 = vadd.f32 1.0, %v1932_v13 }
 0x550   :  { %1933 = vrcp.f32 %v569_v12  ;;  %v581_v23 = vand.u32 2147483648, %v569_v12  ;;  %vm575_vm15 = vweird.f32 %v569_v12  ;;  %v579_v24 = vand.u32 2147483647, %v569_v12 }
 0x551   :  { %1935 = vrcp.f32 %v477_v14  ;;  %v489_v33 = vand.u32 2147483648, %v477_v14  ;;  %vm483_vm4 = vweird.f32 %v477_v14  ;;  %v487_v44 = vand.u32 2147483647, %v477_v14 }
 0x552   :  { %v582_v27 = vor.u32 1.1754944e-38, %v581_v23  ;;  %vm580_vm2 = vcmp.eq.f32.partialorder %v579_v24, 8.507059e+37 }
 0x553   :  { %v490_v32 = vor.u32 1.1754944e-38, %v489_v33  ;;  %vm488_vm7 = vcmp.eq.f32.partialorder %v487_v44, 8.507059e+37 }
 0x556   :  { %v1934_v15 = vpop.eup %1933 }
 0x557   :  { %v571_v16 = vmul.f32 %v1934_v15, %v569_v12  ;;  %v1936_v17 = vpop.eup %1935  ;;  %vm576_vm14 = vweird.f32 %v1934_v15 }
 0x558   :  { %v479_v19 = vmul.f32 %v1936_v17, %v477_v14  ;;  %vm577_vm1 = vmor %vm575_vm15, %vm576_vm14  ;;  %vm484_vm3 = vweird.f32 %v1936_v17 }
 0x559   :  { %v572_v18 = vsub.f32 1.0, %v571_v16  ;;  %vm485_vm6 = vmor %vm483_vm4, %vm484_vm3 }
 0x55a   :  { %v480_v21 = vsub.f32 1.0, %v479_v19 }
 0x55b   :  { %v573_v20 = vmul.f32 %v1934_v15, %v572_v18 }
 0x55c   :  { %v481_v25 = vmul.f32 %v1936_v17, %v480_v21 }
 0x55d   :  { %v574_v22 = vadd.f32 %v1934_v15, %v573_v20 }
 0x55e   :  { %v482_v28 = vadd.f32 %v1936_v17, %v481_v25 }
 0x55f   :  { %v578_v26 = vsel %vm577_vm1, %v1934_v15, %v574_v22 }
 0x560   :  { %v583_v29 = vsel %vm580_vm2, %v582_v27, %v578_v26  ;;  %v486_v45 = vsel %vm485_vm6, %v1936_v17, %v482_v28 }
 0x561   :  { %v491_v47 = vsel %vm488_vm7, %v490_v32, %v486_v45  ;;  %v589_v56 = vmul.f32 %v587_v55, %v583_v29 }
 0x562   :  { %v494_v61 = vmul.f32 %v491_v47, %v2419_v43 }
 0x5b9   :  { %v592_v31 = vpop.permute.xlu0 %591 }
 0x5ba   :  { %v594_v42 = vmul.f32 %v592_v31, %v583_v29 }
 0x5bc   :  { %596 = vrot.lane.b32.xlu2 %v594_v42, %s2194_s3 }
 0x5bf   :  { %v497_v46 = vpop.permute.xlu1 %496 }
 0x5c0   :  { %v499_v49 = vmul.f32 %v497_v46, %v491_v47 }
 0x5c2   :  { %501 = vrot.lane.b32.xlu0 %v499_v49, %s2194_s3 }
 0x616   :  { %v597_v58 = vpop.permute.xlu2 %596 }
 0x617   :  { %v2478_v59 = vadd.f32 %v597_v58, %v589_v56 }
 0x619   :  { %1937 = vtanh.f32 %v2478_v59 }
 0x61f   :  { %v1938_v60 = vpop.eup %1937 }
 0x620   :  { %602 = vrot.lane.b32.xlu1 %v1938_v60, %s2193_s2 }
 0x634   :  { %v502_v62 = vpop.permute.xlu0 %501 }
 0x635   :  { %v2483_v63 = vadd.f32 %v502_v62, %v494_v61 }
 0x637   :  { %1939 = vtanh.f32 %v2483_v63 }
 0x63d   :  { %v1940_v0 = vpop.eup %1939 }
 0x63e   :  { %507 = vrot.lane.b32.xlu2 %v1940_v0, %s2193_s2 }
 0x692   :  { %v603_v30 = vpop.permute.xlu1 %602 }
 0x693   :  { %v605_v2 = vmul.f32 %v603_v30, %v583_v29 }
 0x695   :  { %v627_v4 = vrot.slane %v605_v2, 4 }
 0x697   :  { %628 = vrot.lane.b32.xlu1 %v627_v4, %s2194_s3 }
 0x698   :  { %v508_v5 = vpop.permute.xlu2 %507 }
 0x699   :  { %v2488_v8 = vmul.f32 %v508_v5, %v491_v47 }
 0x69b   :  { %512 = vrot.lane.b32.xlu0 %v2488_v8, %s2194_s3 }
 0x709   :  { %v629_v43 = vpop.permute.xlu1 %628 }
 0x70a   :  { %1826 = vmatmul.msk.f32.vlgmr.msra.gmra.mxu0 %vm174_vm5, %v629_v43  ;;  %1829 = vmatmul.msk.f32.vlgmr.msrb.gmra.mxu2 %vm174_vm5, %v629_v43  ;;  %v766_v43 = vrot.slane %v2478_v59, 6 }
 0x70b   :  { %1087 = vmatpush.msrb.mxu2 %v2309_v1  ;;  %998 = vmatpush.msra.mxu0 %v2354_v36 }
 0x70d   :  { %v513_v10 = vpop.permute.xlu0 %512  ;;  %1088 = vmatpush.msrb.mxu2 %v2314_v3  ;;  %999 = vmatpush.msra.mxu0 %v2356_v37 }
 0x70e   :  { %1822 = vmatmul.msk.f32.vlgmr.msra.gmra.mxu1 %vm174_vm5, %v513_v10  ;;  %1825 = vmatmul.msk.f32.vlgmr.msra.gmra.mxu3 %vm174_vm5, %v513_v10 }
 0x70f   :  { %1089 = vmatpush.msrb.mxu2 %v2323_v6  ;;  %1000 = vmatpush.msra.mxu0 %v2363_v39 }
 0x710   :  { %886 = vmatpush.msra.mxu1 %v2427_v48  ;;  %973 = vmatpush.msra.mxu3 %v2349_v34 }
 0x711   :  { %1090 = vmatpush.msrb.mxu2 %v2328_v7  ;;  %1001 = vmatpush.msra.mxu0 %v2370_v41 }
 0x712   :  { %887 = vmatpush.msra.mxu1 %v2436_v52  ;;  %974 = vmatpush.msra.mxu3 %v2351_v35 }
 0x714   :  { %888 = vmatpush.msra.mxu1 %v2438_v53  ;;  %975 = vmatpush.msra.mxu3 %v2358_v38 }
 0x716   :  { %889 = vmatpush.msra.mxu1 %v2441_v54  ;;  %976 = vmatpush.msra.mxu3 %v2365_v40 }
 0x787   :  { %v649_v15 = vpop.f32.mrf.mxu0 }
 0x78d   :  { %v738_v12 = vpop.f32.mrf.mxu2 }
 0x78e   :  { %v742_v13 = vrot.slane %v738_v12, 2 }
 0x790   :  { %v744_v14 = vadd.f32 %v742_v13, %v2340_v11 }
 0x791   :  { %v623_v16 = vpop.f32.mrf.mxu3 }
 0x792   :  { %1941 = vtanh.f32 %v744_v14  ;;  %v650_v17 = vadd.f32 %v649_v15, %v623_v16  ;;  %v1830_v24 = vmul.f32 -1.442695, %v744_v14 }
 0x794   :  { %v652_v18 = vadd.f32 %v2408_v51, %v650_v17 }
 0x796   :  { %1943 = vtanh.f32 %v652_v18  ;;  %v1827_v21 = vmul.f32 -1.442695, %v652_v18 }
 0x798   :  { %v1942_v19 = vpop.eup %1941  ;;  %1945 = vpow2.f32 %v1827_v21 }
 0x799   :  { %770 = vrot.lane.b32.xlu0 %v1942_v19, %s2193_s2 }
 0x79c   :  { %v1944_v20 = vpop.eup %1943 }
 0x79d   :  { %675 = vrot.lane.b32.xlu2 %v1944_v20, %s2193_s2 }
 0x79e   :  { %v1946_v22 = vpop.eup %1945 }
 0x79f   :  { %v656_v23 = vadd.f32 1.0, %v1946_v22 }
 0x7a1   :  { %1947 = vrcp.f32 %v656_v23  ;;  %v668_v33 = vand.u32 2147483648, %v656_v23  ;;  %vm662_vm9 = vweird.f32 %v656_v23  ;;  %v666_v42 = vand.u32 2147483647, %v656_v23 }
 0x7a2   :  { %1949 = vpow2.f32 %v1830_v24 }
 0x7a3   :  { %v669_v32 = vor.u32 1.1754944e-38, %v668_v33  ;;  %vm667_vm11 = vcmp.eq.f32.partialorder %v666_v42, 8.507059e+37 }
 0x7a7   :  { %v1948_v11 = vpop.eup %1947 }
 0x7a8   :  { %v658_v25 = vmul.f32 %v1948_v11, %v656_v23  ;;  %v1950_v26 = vpop.eup %1949  ;;  %vm663_vm8 = vweird.f32 %v1948_v11 }
 0x7a9   :  { %v748_v28 = vadd.f32 1.0, %v1950_v26  ;;  %vm664_vm10 = vmor %vm662_vm9, %vm663_vm8 }
 0x7aa   :  { %v659_v27 = vsub.f32 1.0, %v658_v25 }
 0x7ab   :  { %1951 = vrcp.f32 %v748_v28  ;;  %v760_v61 = vand.u32 2147483648, %v748_v28  ;;  %vm754_vm13 = vweird.f32 %v748_v28  ;;  %v758_v62 = vand.u32 2147483647, %v748_v28 }
 0x7ac   :  { %v660_v29 = vmul.f32 %v1948_v11, %v659_v27  ;;  %v2556_v27 = vadd.f32 %v2337_v9, %v2469_v57 }
 0x7ad   :  { %v761_v30 = vor.u32 1.1754944e-38, %v760_v61  ;;  %vm759_vm15 = vcmp.eq.f32.partialorder %v758_v62, 8.507059e+37 }
 0x7ae   :  { %v661_v31 = vadd.f32 %v1948_v11, %v660_v29 }
 0x7b0   :  { %v665_v44 = vsel %vm664_vm10, %v1948_v11, %v661_v31 }
 0x7b1   :  { %v1952_v45 = vpop.eup %1951  ;;  %v670_v47 = vsel %vm667_vm11, %v669_v32, %v665_v44 }
 0x7b2   :  { %v750_v55 = vmul.f32 %v1952_v45, %v748_v28  ;;  %vm755_vm12 = vweird.f32 %v1952_v45  ;;  %v673_v14 = vmul.f32 %v670_v47, %v2483_v63 }
 0x7b3   :  { %vm756_vm14 = vmor %vm754_vm13, %vm755_vm12 }
 0x7b4   :  { %v751_v56 = vsub.f32 1.0, %v750_v55 }
 0x7b6   :  { %v752_v58 = vmul.f32 %v1952_v45, %v751_v56 }
 0x7b8   :  { %v753_v60 = vadd.f32 %v1952_v45, %v752_v58 }
 0x7ba   :  { %v757_v0 = vsel %vm756_vm14, %v1952_v45, %v753_v60 }
 0x7bb   :  { %v762_v2 = vsel %vm759_vm15, %v761_v30, %v757_v0 }
 0x7bc   :  { %v768_v10 = vmul.f32 %v766_v43, %v762_v2 }
 0x7f7   :  { %v676_v46 = vpop.permute.xlu2 %675 }
 0x7f8   :  { %v678_v49 = vmul.f32 %v676_v46, %v670_v47 }
 0x7fa   :  { %680 = vrot.lane.b32.xlu1 %v678_v49, %s2194_s3 }
 0x80b   :  { %v771_v4 = vpop.permute.xlu0 %770 }
 0x80c   :  { %v773_v5 = vmul.f32 %v771_v4, %v762_v2 }
 0x80e   :  { %775 = vrot.lane.b32.xlu2 %v773_v5, %s2194_s3 }
 0x868   :  { %v776_v12 = vpop.permute.xlu2 %775 }
 0x869   :  { %v2519_v13 = vadd.f32 %v776_v12, %v768_v10 }
 0x86b   :  { %1953 = vtanh.f32 %v2519_v13 }
 0x86c   :  { %v681_v15 = vpop.permute.xlu1 %680 }
 0x86d   :  { %v2523_v16 = vadd.f32 %v681_v15, %v673_v14 }
 0x86f   :  { %1955 = vtanh.f32 %v2523_v16 }
 0x871   :  { %v1954_v17 = vpop.eup %1953 }
 0x872   :  { %781 = vrot.lane.b32.xlu1 %v1954_v17, %s2193_s2 }
 0x875   :  { %v1956_v18 = vpop.eup %1955 }
 0x876   :  { %686 = vrot.lane.b32.xlu0 %v1956_v18, %s2193_s2 }
 0x8e4   :  { %v782_v59 = vpop.permute.xlu1 %781 }
 0x8e5   :  { %v784_v19 = vmul.f32 %v782_v59, %v762_v2 }
 0x8e7   :  { %v806_v20 = vrot.slane %v784_v19, 6 }
 0x8e8   :  { %v687_v21 = vpop.permute.xlu0 %686 }
 0x8e9   :  { %v2528_v22 = vmul.f32 %v687_v21, %v670_v47  ;;  %807 = vrot.lane.b32.xlu0 %v806_v20, %s2194_s3  ;;  %v942_v21 = vrot.slane %v2519_v13, 6 }
 0x8eb   :  { %691 = vrot.lane.b32.xlu2 %v2528_v22, %s2194_s3 }
 0x945   :  { %v692_v63 = vpop.permute.xlu2 %691 }
 0x946   :  { %1828 = vmatmul.msk.f32.vlgmr.msrb.gmra.mxu1 %vm174_vm5, %v692_v63  ;;  %1831 = vmatmul.msk.f32.vlgmr.msrb.gmra.mxu3 %vm174_vm5, %v692_v63 }
 0x947   :  { %1061 = vmatpush.msrb.mxu1 %v2427_v48  ;;  %1151 = vmatpush.msrb.mxu3 %v2349_v34 }
 0x949   :  { %1062 = vmatpush.msrb.mxu1 %v2436_v52  ;;  %1152 = vmatpush.msrb.mxu3 %v2351_v35 }
 0x94b   :  { %1063 = vmatpush.msrb.mxu1 %v2438_v53  ;;  %1153 = vmatpush.msrb.mxu3 %v2358_v38 }
 0x94d   :  { %1064 = vmatpush.msrb.mxu1 %v2441_v54  ;;  %1154 = vmatpush.msrb.mxu3 %v2365_v40 }
 0x95b   :  { %v808_v23 = vpop.permute.xlu0 %807 }
 0x95c   :  { %1832 = vmatmul.msk.f32.vlgmr.msrb.gmra.mxu0 %vm174_vm5, %v808_v23  ;;  %1835 = vmatmul.msk.f32.vlgmr.msra.gmra.mxu2 %vm174_vm5, %v808_v23 }
 0x95d   :  { %1266 = vmatpush.msra.mxu2 %v2309_v1  ;;  %1177 = vmatpush.msrb.mxu0 %v2354_v36 }
 0x95f   :  { %1267 = vmatpush.msra.mxu2 %v2314_v3  ;;  %1178 = vmatpush.msrb.mxu0 %v2356_v37 }
 0x961   :  { %1268 = vmatpush.msra.mxu2 %v2323_v6  ;;  %1179 = vmatpush.msrb.mxu0 %v2363_v39 }
 0x963   :  { %1269 = vmatpush.msra.mxu2 %v2328_v7  ;;  %1180 = vmatpush.msrb.mxu0 %v2370_v41 }
 0x9c9   :  { %v802_v24 = vpop.f32.mrf.mxu3 }
 0x9d9   :  { %v828_v11 = vpop.f32.mrf.mxu0 }
 0x9da   :  { %v829_v25 = vadd.f32 %v828_v11, %v802_v24 }
 0x9dc   :  { %v831_v26 = vadd.f32 %v2408_v51, %v829_v25 }
 0x9de   :  { %1957 = vtanh.f32 %v831_v26  ;;  %v1833_v32 = vmul.f32 -1.442695, %v831_v26 }
 0x9df   :  { %v917_v28 = vpop.f32.mrf.mxu2 }
 0x9e0   :  { %v920_v29 = vadd.f32 %v917_v28, %v2556_v27 }
 0x9e2   :  { %1959 = vtanh.f32 %v920_v29  ;;  %v1836_v42 = vmul.f32 -1.442695, %v920_v29 }
 0x9e4   :  { %v1958_v31 = vpop.eup %1957  ;;  %1961 = vpow2.f32 %v1836_v42 }
 0x9e5   :  { %854 = vrot.lane.b32.xlu1 %v1958_v31, %s2193_s2 }
 0x9e8   :  { %v1960_v33 = vpop.eup %1959 }
 0x9e9   :  { %946 = vrot.lane.b32.xlu2 %v1960_v33, %s2193_s2 }
 0x9ea   :  { %v1962_v44 = vpop.eup %1961 }
 0x9eb   :  { %v924_v45 = vadd.f32 1.0, %v1962_v44 }
 0x9ed   :  { %1963 = vrcp.f32 %v924_v45  ;;  %v936_v58 = vand.u32 2147483648, %v924_v45  ;;  %vm930_vm2 = vweird.f32 %v924_v45  ;;  %v934_v60 = vand.u32 2147483647, %v924_v45 }
 0x9ee   :  { %1965 = vpow2.f32 %v1833_v32 }
 0x9ef   :  { %v937_v0 = vor.u32 1.1754944e-38, %v936_v58  ;;  %vm935_vm4 = vcmp.eq.f32.partialorder %v934_v60, 8.507059e+37 }
 0x9f3   :  { %v1964_v46 = vpop.eup %1963 }
 0x9f4   :  { %v926_v9 = vmul.f32 %v1964_v46, %v924_v45  ;;  %v1966_v57 = vpop.eup %1965  ;;  %vm931_vm1 = vweird.f32 %v1964_v46 }
 0x9f5   :  { %v835_v49 = vadd.f32 1.0, %v1966_v57  ;;  %vm932_vm3 = vmor %vm930_vm2, %vm931_vm1 }
 0x9f6   :  { %v927_v47 = vsub.f32 1.0, %v926_v9 }
 0x9f7   :  { %1967 = vrcp.f32 %v835_v49  ;;  %v847_v14 = vand.u32 2147483648, %v835_v49  ;;  %vm841_vm7 = vweird.f32 %v835_v49  ;;  %v845_v15 = vand.u32 2147483647, %v835_v49 }
 0x9f8   :  { %v928_v55 = vmul.f32 %v1964_v46, %v927_v47 }
 0x9f9   :  { %v848_v18 = vor.u32 1.1754944e-38, %v847_v14  ;;  %vm846_vm9 = vcmp.eq.f32.partialorder %v845_v15, 8.507059e+37 }
 0x9fa   :  { %v929_v56 = vadd.f32 %v1964_v46, %v928_v55 }
 0x9fc   :  { %v933_v61 = vsel %vm932_vm3, %v1964_v46, %v929_v56 }
 0x9fd   :  { %v1968_v62 = vpop.eup %1967  ;;  %v938_v2 = vsel %vm935_vm4, %v937_v0, %v933_v61 }
 0x9fe   :  { %v837_v5 = vmul.f32 %v1968_v62, %v835_v49  ;;  %vm842_vm6 = vweird.f32 %v1968_v62  ;;  %v944_v63 = vmul.f32 %v942_v21, %v938_v2 }
 0x9ff   :  { %vm843_vm8 = vmor %vm841_vm7, %vm842_vm6 }
 0xa00   :  { %v838_v43 = vsub.f32 1.0, %v837_v5 }
 0xa02   :  { %v839_v10 = vmul.f32 %v1968_v62, %v838_v43 }
 0xa04   :  { %v840_v12 = vadd.f32 %v1968_v62, %v839_v10 }
 0xa06   :  { %v844_v17 = vsel %vm843_vm8, %v1968_v62, %v840_v12 }
 0xa07   :  { %v849_v19 = vsel %vm846_vm9, %v848_v18, %v844_v17 }
 0xa08   :  { %v852_v25 = vmul.f32 %v849_v19, %v2523_v16 }
 0xa43   :  { %v947_v30 = vpop.permute.xlu2 %946 }
 0xa44   :  { %v949_v4 = vmul.f32 %v947_v30, %v938_v2 }
 0xa46   :  { %951 = vrot.lane.b32.xlu1 %v949_v4, %s2194_s3 }
 0xa57   :  { %v855_v59 = vpop.permute.xlu1 %854 }
 0xa58   :  { %v857_v20 = vmul.f32 %v855_v59, %v849_v19 }
 0xa5a   :  { %859 = vrot.lane.b32.xlu0 %v857_v20, %s2194_s3 }
 0xab8   :  { %v952_v23 = vpop.permute.xlu1 %951 }
 0xab9   :  { %v2564_v24 = vadd.f32 %v952_v23, %v944_v63 }
 0xabb   :  { %1969 = vtanh.f32 %v2564_v24  ;;  %v1120_v63 = vrot.slane %v2564_v24, 6 }
 0xac1   :  { %v1970_v11 = vpop.eup %1969 }
 0xac2   :  { %957 = vrot.lane.b32.xlu0 %v1970_v11, %s2193_s2 }
 0xacc   :  { %v860_v26 = vpop.permute.xlu0 %859 }
 0xacd   :  { %v2569_v28 = vadd.f32 %v860_v26, %v852_v25 }
 0xacf   :  { %1971 = vtanh.f32 %v2569_v28 }
 0xad5   :  { %v1972_v29 = vpop.eup %1971 }
 0xad6   :  { %865 = vrot.lane.b32.xlu2 %v1972_v29, %s2193_s2 }
 0xb30   :  { %v866_v13 = vpop.permute.xlu2 %865 }
 0xb31   :  { %v2573_v31 = vmul.f32 %v866_v13, %v849_v19 }
 0xb33   :  { %870 = vrot.lane.b32.xlu1 %v2573_v31, %s2194_s3 }
 0xb34   :  { %v958_v33 = vpop.permute.xlu0 %957 }
 0xb35   :  { %v960_v42 = vmul.f32 %v958_v33, %v938_v2 }
 0xb37   :  { %982 = vrot.lane.b32.xlu2 %v960_v42, %s2194_s3 }
 0xb91   :  { %v983_v44 = vpop.permute.xlu2 %982 }
 0xb92   :  { %1838 = vmatmul.msk.f32.vlgmr.msra.gmra.mxu0 %vm174_vm5, %v983_v44  ;;  %1841 = vmatmul.msk.f32.vlgmr.msrb.gmra.mxu2 %vm174_vm5, %v983_v44 }
 0xb93   :  { %1356 = vmatpush.msra.mxu0 %v2354_v36  ;;  %1445 = vmatpush.msrb.mxu2 %v2309_v1 }
 0xb95   :  { %1357 = vmatpush.msra.mxu0 %v2356_v37  ;;  %1446 = vmatpush.msrb.mxu2 %v2314_v3 }
 0xb97   :  { %1358 = vmatpush.msra.mxu0 %v2363_v39  ;;  %1447 = vmatpush.msrb.mxu2 %v2323_v6 }
 0xb99   :  { %1359 = vmatpush.msra.mxu0 %v2370_v41  ;;  %1448 = vmatpush.msrb.mxu2 %v2328_v7 }
 0xba5   :  { %v871_v16 = vpop.permute.xlu1 %870 }
 0xba6   :  { %1834 = vmatmul.msk.f32.vlgmr.msra.gmra.mxu1 %vm174_vm5, %v871_v16  ;;  %1837 = vmatmul.msk.f32.vlgmr.msra.gmra.mxu3 %vm174_vm5, %v871_v16 }
 0xba7   :  { %1240 = vmatpush.msra.mxu1 %v2427_v48  ;;  %1330 = vmatpush.msra.mxu3 %v2349_v34 }
 0xba9   :  { %1241 = vmatpush.msra.mxu1 %v2436_v52  ;;  %1331 = vmatpush.msra.mxu3 %v2351_v35 }
 0xbab   :  { %1242 = vmatpush.msra.mxu1 %v2438_v53  ;;  %1332 = vmatpush.msra.mxu3 %v2358_v38 }
 0xbad   :  { %1243 = vmatpush.msra.mxu1 %v2441_v54  ;;  %1333 = vmatpush.msra.mxu3 %v2365_v40 }
 0xc0f   :  { %v1003_v34 = vpop.f32.mrf.mxu0 }
 0xc15   :  { %v1092_v1 = vpop.f32.mrf.mxu2 }
 0xc16   :  { %v1096_v3 = vrot.slane %v1092_v1, 6  ;;  %v2049_v1 = vld [vmem:[#allocation6 + $0x18] sm:$0xff] }
 0xc18   :  { %v1098_v6 = vadd.f32 %v1096_v3, %v2556_v27  ;;  %v2050_v3 = vld [vmem:[#allocation6 + $0x10] sm:$0xff] }
 0xc1a   :  { %1973 = vtanh.f32 %v1098_v6  ;;  %v1842_v38 = vmul.f32 -1.442695, %v1098_v6  ;;  %v2051_v6 = vld [vmem:[#allocation6 + $0x8] sm:$0xff] }
 0xc20   :  { %v1974_v7 = vpop.eup %1973 }
 0xc21   :  { %1124 = vrot.lane.b32.xlu1 %v1974_v7, %s2193_s2  ;;  %v2052_v7 = vld [vmem:[#allocation6] sm:$0xff] }
 0xc29   :  { %v978_v36 = vpop.f32.mrf.mxu3 }
 0xc2a   :  { %v1004_v37 = vadd.f32 %v1003_v34, %v978_v36  ;;  %v2053_v36 = vld [vmem:[#allocation8 + $0x18] sm:$0xff] }
 0xc2c   :  { %v1006_v35 = vadd.f32 %v2408_v51, %v1004_v37  ;;  %v2054_v37 = vld [vmem:[#allocation8 + $0x10] sm:$0xff] }
 0xc2e   :  { %1975 = vtanh.f32 %v1006_v35  ;;  %v1839_v45 = vmul.f32 -1.442695, %v1006_v35  ;;  %v2055_v35 = vld [vmem:[#allocation8 + $0x8] sm:$0xff] }
 0xc2f   :  { %1977 = vpow2.f32 %v1842_v38 }
 0xc34   :  { %v1976_v39 = vpop.eup %1975 }
 0xc35   :  { %1029 = vrot.lane.b32.xlu0 %v1976_v39, %s2193_s2  ;;  %v1978_v40 = vpop.eup %1977  ;;  %v2056_v39 = vld [vmem:[#allocation8] sm:$0xff] }
 0xc36   :  { %v1102_v41 = vadd.f32 1.0, %v1978_v40 }
 0xc38   :  { %1979 = vrcp.f32 %v1102_v41  ;;  %v1114_v56 = vand.u32 2147483648, %v1102_v41  ;;  %vm1108_vm11 = vweird.f32 %v1102_v41  ;;  %v1112_v58 = vand.u32 2147483647, %v1102_v41 }
 0xc39   :  { %1981 = vpow2.f32 %v1839_v45 }
 0xc3a   :  { %v1115_v62 = vor.u32 1.1754944e-38, %v1114_v56  ;;  %vm1113_vm13 = vcmp.eq.f32.partialorder %v1112_v58, 8.507059e+37 }
 0xc3e   :  { %v1980_v32 = vpop.eup %1979 }
 0xc3f   :  { %v1104_v46 = vmul.f32 %v1980_v32, %v1102_v41  ;;  %v1982_v9 = vpop.eup %1981  ;;  %vm1109_vm10 = vweird.f32 %v1980_v32 }
 0xc40   :  { %v1010_v47 = vadd.f32 1.0, %v1982_v9  ;;  %vm1110_vm12 = vmor %vm1108_vm11, %vm1109_vm10 }
 0xc41   :  { %v1105_v57 = vsub.f32 1.0, %v1104_v46 }
 0xc42   :  { %1983 = vrcp.f32 %v1010_v47  ;;  %v1022_v12 = vand.u32 2147483648, %v1010_v47  ;;  %vm1016_vm15 = vweird.f32 %v1010_v47  ;;  %v1020_v14 = vand.u32 2147483647, %v1010_v47 }
 0xc43   :  { %v1106_v49 = vmul.f32 %v1980_v32, %v1105_v57 }
 0xc44   :  { %v1023_v17 = vor.u32 1.1754944e-38, %v1022_v12  ;;  %vm1021_vm2 = vcmp.eq.f32.partialorder %v1020_v14, 8.507059e+37 }
 0xc45   :  { %v1107_v55 = vadd.f32 %v1980_v32, %v1106_v49 }
 0xc47   :  { %v1111_v60 = vsel %vm1110_vm12, %v1980_v32, %v1107_v55 }
 0xc48   :  { %v1984_v61 = vpop.eup %1983  ;;  %v1116_v30 = vsel %vm1113_vm13, %v1115_v62, %v1111_v60 }
 0xc49   :  { %v1012_v4 = vmul.f32 %v1984_v61, %v1010_v47  ;;  %vm1017_vm14 = vweird.f32 %v1984_v61  ;;  %v1122_v11 = vmul.f32 %v1120_v63, %v1116_v30 }
 0xc4a   :  { %vm1018_vm1 = vmor %vm1016_vm15, %vm1017_vm14 }
 0xc4b   :  { %v1013_v5 = vsub.f32 1.0, %v1012_v4 }
 0xc4d   :  { %v1014_v43 = vmul.f32 %v1984_v61, %v1013_v5 }
 0xc4f   :  { %v1015_v10 = vadd.f32 %v1984_v61, %v1014_v43 }
 0xc51   :  { %v1019_v15 = vsel %vm1018_vm1, %v1984_v61, %v1015_v10 }
 0xc52   :  { %v1024_v59 = vsel %vm1021_vm2, %v1023_v17, %v1019_v15 }
 0xc53   :  { %v1027_v20 = vmul.f32 %v1024_v59, %v2569_v28 }
 0xc93   :  { %v1125_v0 = vpop.permute.xlu1 %1124 }
 0xc94   :  { %v1127_v2 = vmul.f32 %v1125_v0, %v1116_v30 }
 0xc96   :  { %1129 = vrot.lane.b32.xlu0 %v1127_v2, %s2194_s3 }
 0xca7   :  { %v1030_v18 = vpop.permute.xlu0 %1029 }
 0xca8   :  { %v1032_v19 = vmul.f32 %v1030_v18, %v1024_v59 }
 0xcaa   :  { %1034 = vrot.lane.b32.xlu2 %v1032_v19, %s2194_s3 }
 0xd04   :  { %v1035_v21 = vpop.permute.xlu2 %1034 }
 0xd05   :  { %v2606_v23 = vadd.f32 %v1035_v21, %v1027_v20 }
 0xd07   :  { %1985 = vtanh.f32 %v2606_v23 }
 0xd08   :  { %v1130_v25 = vpop.permute.xlu0 %1129 }
 0xd09   :  { %v2609_v26 = vadd.f32 %v1130_v25, %v1122_v11 }
 0xd0b   :  { %1987 = vtanh.f32 %v2609_v26 }
 0xd0d   :  { %v1986_v29 = vpop.eup %1985 }
 0xd0e   :  { %1040 = vrot.lane.b32.xlu1 %v1986_v29, %s2193_s2 }
 0xd11   :  { %v1988_v13 = vpop.eup %1987 }
 0xd12   :  { %1135 = vrot.lane.b32.xlu2 %v1988_v13, %s2193_s2 }
 0xd6c   :  { %v1136_v28 = vpop.permute.xlu2 %1135 }
 0xd6d   :  { %v1138_v33 = vmul.f32 %v1136_v28, %v1116_v30 }
 0xd6f   :  { %v1160_v42 = vrot.slane %v1138_v33, 2  ;;  %v1299_v33 = vrot.slane %v2609_v26, 6 }
 0xd71   :  { %1161 = vrot.lane.b32.xlu1 %v1160_v42, %s2194_s3 }
 0xd80   :  { %v1041_v24 = vpop.permute.xlu1 %1040 }
 0xd81   :  { %v2615_v44 = vmul.f32 %v1041_v24, %v1024_v59 }
 0xd83   :  { %1045 = vrot.lane.b32.xlu0 %v2615_v44, %s2194_s3 }
 0xde3   :  { %v1162_v16 = vpop.permute.xlu1 %1161 }
 0xde4   :  { %1844 = vmatmul.msk.f32.vlgmr.msrb.gmra.mxu0 %vm174_vm5, %v1162_v16  ;;  %1847 = vmatmul.msk.f32.vlgmr.msra.gmra.mxu2 %vm174_vm5, %v1162_v16 }
 0xde5   :  { %1535 = vmatpush.msrb.mxu0 %v2049_v1 }
 0xde7   :  { %1536 = vmatpush.msrb.mxu0 %v2050_v3 }
 0xde9   :  { %1537 = vmatpush.msrb.mxu0 %v2051_v6 }
 0xdeb   :  { %1538 = vmatpush.msrb.mxu0 %v2052_v7 }
 0xdf5   :  { %v1046_v34 = vpop.permute.xlu0 %1045 }
 0xdf6   :  { %1840 = vmatmul.msk.f32.vlgmr.msrb.gmra.mxu1 %vm174_vm5, %v1046_v34  ;;  %1843 = vmatmul.msk.f32.vlgmr.msrb.gmra.mxu3 %vm174_vm5, %v1046_v34 }
 0xdf7   :  { %1509 = vmatpush.msrb.mxu3 %v2053_v36  ;;  %1419 = vmatpush.msrb.mxu1 %v2427_v48 }
 0xdf9   :  { %1510 = vmatpush.msrb.mxu3 %v2054_v37  ;;  %1420 = vmatpush.msrb.mxu1 %v2436_v52 }
 0xdfb   :  { %1511 = vmatpush.msrb.mxu3 %v2055_v35  ;;  %1421 = vmatpush.msrb.mxu1 %v2438_v53 }
 0xdfd   :  { %1512 = vmatpush.msrb.mxu3 %v2056_v39  ;;  %1422 = vmatpush.msrb.mxu1 %v2441_v54 }
 0xe61   :  { %v1182_v32 = vpop.f32.mrf.mxu0 }
 0xe67   :  { %v1271_v38 = vpop.f32.mrf.mxu2 }
 0xe68   :  { %v1275_v40 = vrot.slane %v1271_v38, 4 }
 0xe6a   :  { %v1277_v41 = vadd.f32 %v1275_v40, %v2556_v27 }
 0xe6c   :  { %1989 = vtanh.f32 %v1277_v41  ;;  %v1848_v55 = vmul.f32 -1.442695, %v1277_v41 }
 0xe72   :  { %v1990_v45 = vpop.eup %1989 }
 0xe73   :  { %1303 = vrot.lane.b32.xlu0 %v1990_v45, %s2193_s2 }
 0xe79   :  { %v1156_v46 = vpop.f32.mrf.mxu3 }
 0xe7a   :  { %v1183_v9 = vadd.f32 %v1182_v32, %v1156_v46  ;;  %v2659_v32 = vld [vmem:[%s2775_s6] ss:$0 sm:$0xff]  ;;  %s2210_s6 = smov [#allocation11]  }
 0xe7b   :  { %s1797_s23 = sshll.u32 %s2210_s6, 4  ;;  %s1798_s23 = int_to_ptr.vmem [resolvable:$true] %s1797_s23 }
 0xe7c   :  { %v1185_v57 = vadd.f32 %v2408_v51, %v1183_v9 }
 0xe7e   :  { %1991 = vtanh.f32 %v1185_v57  ;;  %v1845_v49 = vmul.f32 -1.442695, %v1185_v57 }
 0xe80   :  { %1993 = vpow2.f32 %v1845_v49 }
 0xe81   :  { %1995 = vpow2.f32 %v1848_v55 }
 0xe84   :  { %v1992_v47 = vpop.eup %1991 }
 0xe85   :  { %1208 = vrot.lane.b32.xlu2 %v1992_v47, %s2193_s2 }
 0xe86   :  { %v1994_v56 = vpop.eup %1993 }
 0xe87   :  { %v1189_v58 = vadd.f32 1.0, %v1994_v56  ;;  %v1996_v60 = vpop.eup %1995 }
 0xe88   :  { %v1281_v61 = vadd.f32 1.0, %v1996_v60 }
 0xe89   :  { %1997 = vrcp.f32 %v1189_v58  ;;  %v1201_v10 = vand.u32 2147483648, %v1189_v58  ;;  %vm1195_vm4 = vweird.f32 %v1189_v58  ;;  %v1199_v12 = vand.u32 2147483647, %v1189_v58 }
 0xe8a   :  { %1999 = vrcp.f32 %v1281_v61  ;;  %v1293_v20 = vand.u32 2147483648, %v1281_v61  ;;  %vm1287_vm9 = vweird.f32 %v1281_v61  ;;  %v1291_v63 = vand.u32 2147483647, %v1281_v61 }
 0xe8b   :  { %v1202_v17 = vor.u32 1.1754944e-38, %v1201_v10  ;;  %vm1200_vm7 = vcmp.eq.f32.partialorder %v1199_v12, 8.507059e+37 }
 0xe8c   :  { %v1294_v25 = vor.u32 1.1754944e-38, %v1293_v20  ;;  %vm1292_vm11 = vcmp.eq.f32.partialorder %v1291_v63, 8.507059e+37 }
 0xe8f   :  { %v1998_v62 = vpop.eup %1997 }
 0xe90   :  { %v1191_v0 = vmul.f32 %v1998_v62, %v1189_v58  ;;  %v2000_v30 = vpop.eup %1999  ;;  %vm1196_vm3 = vweird.f32 %v1998_v62 }
 0xe91   :  { %v1283_v4 = vmul.f32 %v2000_v30, %v1281_v61  ;;  %vm1197_vm6 = vmor %vm1195_vm4, %vm1196_vm3  ;;  %vm1288_vm8 = vweird.f32 %v2000_v30 }
 0xe92   :  { %v1192_v2 = vsub.f32 1.0, %v1191_v0  ;;  %vm1289_vm10 = vmor %vm1287_vm9, %vm1288_vm8 }
 0xe93   :  { %v1284_v5 = vsub.f32 1.0, %v1283_v4 }
 0xe94   :  { %v1193_v51 = vmul.f32 %v1998_v62, %v1192_v2 }
 0xe95   :  { %v1285_v14 = vmul.f32 %v2000_v30, %v1284_v5 }
 0xe96   :  { %v1194_v43 = vadd.f32 %v1998_v62, %v1193_v51 }
 0xe97   :  { %v1286_v18 = vadd.f32 %v2000_v30, %v1285_v14 }
 0xe98   :  { %v1198_v15 = vsel %vm1197_vm6, %v1998_v62, %v1194_v43 }
 0xe99   :  { %v1203_v19 = vsel %vm1200_vm7, %v1202_v17, %v1198_v15  ;;  %v1290_v11 = vsel %vm1289_vm10, %v2000_v30, %v1286_v18  ;;  %vm355_vm10 = vcmask 517120  }
 0xe9a   :  { %v1295_v13 = vsel %vm1292_vm11, %v1294_v25, %v1290_v11  ;;  %v1206_v3 = vmul.f32 %v1203_v19, %v2606_v23  ;;  %vm1640_vm11 = vcmask 7168  }
 0xe9b   :  { %v1301_v42 = vmul.f32 %v1299_v33, %v1295_v13 }
 0xedf   :  { %v1209_v59 = vpop.permute.xlu2 %1208 }
 0xee0   :  { %v1211_v21 = vmul.f32 %v1209_v59, %v1203_v19 }
 0xee2   :  { %1213 = vrot.lane.b32.xlu1 %v1211_v21, %s2194_s3 }
 0xee5   :  { %v1304_v29 = vpop.permute.xlu0 %1303 }
 0xee6   :  { %v1306_v28 = vmul.f32 %v1304_v29, %v1295_v13 }
 0xee8   :  { %1308 = vrot.lane.b32.xlu2 %v1306_v28, %s2194_s3 }
 0xf42   :  { %v1309_v24 = vpop.permute.xlu2 %1308 }
 0xf43   :  { %v2634_v16 = vadd.f32 %v1309_v24, %v1301_v42 }
 0xf45   :  { %2001 = vtanh.f32 %v2634_v16  ;;  %v1478_v29 = vrot.slane %v2634_v16, 6 }
 0xf4b   :  { %v2002_v1 = vpop.eup %2001 }
 0xf4c   :  { %1314 = vrot.lane.b32.xlu1 %v2002_v1, %s2193_s2 }
 0xf54   :  { %v1214_v6 = vpop.permute.xlu1 %1213 }
 0xf55   :  { %v2639_v7 = vadd.f32 %v1214_v6, %v1206_v3 }
 0xf57   :  { %2003 = vtanh.f32 %v2639_v7 }
 0xf5d   :  { %v2004_v34 = vpop.eup %2003 }
 0xf5e   :  { %1219 = vrot.lane.b32.xlu0 %v2004_v34, %s2193_s2 }
 0xfbe   :  { %v1315_v26 = vpop.permute.xlu1 %1314 }
 0xfbf   :  { %v1317_v36 = vmul.f32 %v1315_v26, %v1295_v13 }
 0xfc1   :  { %v1339_v37 = vrot.slane %v1317_v36, 4 }
 0xfc3   :  { %1340 = vrot.lane.b32.xlu0 %v1339_v37, %s2194_s3 }
 0xfd0   :  { %v1220_v35 = vpop.permute.xlu0 %1219 }
 0xfd1   :  { %v2644_v39 = vmul.f32 %v1220_v35, %v1203_v19 }
 0xfd3   :  { %1224 = vrot.lane.b32.xlu2 %v2644_v39, %s2194_s3 }
0x102d   :  { %v1225_v23 = vpop.permute.xlu2 %1224 }
0x102e   :  { %1846 = vmatmul.msk.f32.vlgmr.msra.gmra.mxu1 %vm174_vm5, %v1225_v23  ;;  %1849 = vmatmul.msk.f32.vlgmr.msra.gmra.mxu3 %vm174_vm5, %v1225_v23 }
0x102f   :  { %1598 = vmatpush.msra.mxu1 %v2427_v48 }
0x1031   :  { %1599 = vmatpush.msra.mxu1 %v2436_v52 }
0x1033   :  { %1600 = vmatpush.msra.mxu1 %v2438_v53 }
0x1035   :  { %v1341_v38 = vpop.permute.xlu0 %1340  ;;  %1601 = vmatpush.msra.mxu1 %v2441_v54 }
0x1036   :  { %1850 = vmatmul.msk.f32.vlgmr.msra.gmra.mxu0 %vm174_vm5, %v1341_v38  ;;  %1853 = vmatmul.msk.f32.vlgmr.msrb.gmra.mxu2 %vm174_vm5, %v1341_v38 }
0x10b1   :  { %v1335_v40 = vpop.f32.mrf.mxu3 }
0x10b3   :  { %v1361_v41 = vpop.f32.mrf.mxu0 }
0x10b4   :  { %v1362_v45 = vadd.f32 %v1361_v41, %v1335_v40 }
0x10b6   :  { %v1364_v48 = vadd.f32 %v2659_v32, %v1362_v45 }
0x10b8   :  { %2005 = vtanh.f32 %v1364_v48  ;;  %v1851_v55 = vmul.f32 -1.442695, %v1364_v48 }
0x10b9   :  { %v1450_v52 = vpop.f32.mrf.mxu2 }
0x10ba   :  { %v1454_v53 = vrot.slane %v1450_v52, 2 }
0x10bc   :  { %v1456_v46 = vadd.f32 %v1454_v53, %v2556_v27 }
0x10be   :  { %v2006_v54 = vpop.eup %2005  ;;  %2007 = vtanh.f32 %v1456_v46  ;;  %v1854_v57 = vmul.f32 -1.442695, %v1456_v46 }
0x10bf   :  { %1387 = vrot.lane.b32.xlu1 %v2006_v54, %s2193_s2 }
0x10c0   :  { %2009 = vpow2.f32 %v1854_v57 }
0x10c4   :  { %v2008_v9 = vpop.eup %2007 }
0x10c5   :  { %1482 = vrot.lane.b32.xlu2 %v2008_v9, %s2193_s2 }
0x10c6   :  { %v2010_v47 = vpop.eup %2009 }
0x10c7   :  { %v1460_v49 = vadd.f32 1.0, %v2010_v47  ;;  %v347_v47 = vpop.f32.mrf.mxu1 }
0x10c9   :  { %2011 = vrcp.f32 %v1460_v49  ;;  %v1472_v30 = vand.u32 2147483648, %v1460_v49  ;;  %vm1466_vm13 = vweird.f32 %v1460_v49  ;;  %v1470_v2 = vand.u32 2147483647, %v1460_v49 }
0x10ca   :  { %2013 = vpow2.f32 %v1851_v55 }
0x10cb   :  { %v1473_v5 = vor.u32 1.1754944e-38, %v1472_v30  ;;  %vm1471_vm15 = vcmp.eq.f32.partialorder %v1470_v2, 8.507059e+37 }
0x10cf   :  { %v2012_v56 = vpop.eup %2011 }
0x10d0   :  { %v1462_v58 = vmul.f32 %v2012_v56, %v1460_v49  ;;  %v2014_v60 = vpop.eup %2013  ;;  %vm1467_vm12 = vweird.f32 %v2012_v56 }
0x10d1   :  { %v1368_v62 = vadd.f32 1.0, %v2014_v60  ;;  %vm1468_vm14 = vmor %vm1466_vm13, %vm1467_vm12  ;;  %v533_v60 = vpop.f32.mrf.mxu1  ;;  %vm1642_vm12 = vcmask 15360   ;;  %vm1644_vm13 = vcmask 23552  }
0x10d2   :  { %v1463_v61 = vsub.f32 1.0, %v1462_v58 }
0x10d3   :  { %2015 = vrcp.f32 %v1368_v62  ;;  %v1380_v59 = vand.u32 2147483648, %v1368_v62  ;;  %vm1374_vm2 = vweird.f32 %v1368_v62  ;;  %v1378_v19 = vand.u32 2147483647, %v1368_v62 }
0x10d4   :  { %v1464_v27 = vmul.f32 %v2012_v56, %v1463_v61 }
0x10d5   :  { %v1381_v21 = vor.u32 1.1754944e-38, %v1380_v59  ;;  %vm1379_vm4 = vcmp.eq.f32.partialorder %v1378_v19, 8.507059e+37 }
0x10d6   :  { %v1465_v0 = vadd.f32 %v2012_v56, %v1464_v27 }
0x10d8   :  { %v1469_v51 = vsel %vm1468_vm14, %v2012_v56, %v1465_v0  ;;  %vm1646_vm14 = vcmask 31744  }
0x10d9   :  { %v2016_v4 = vpop.eup %2015  ;;  %v1474_v12 = vsel %vm1471_vm15, %v1473_v5, %v1469_v51  ;;  %v712_v0 = vpop.f32.mrf.mxu1  ;;  %vm1648_vm15 = vcmask 39936  }
0x10da   :  { %v1370_v43 = vmul.f32 %v2016_v4, %v1368_v62  ;;  %vm1375_vm1 = vweird.f32 %v2016_v4  ;;  %v1480_v13 = vmul.f32 %v1478_v29, %v1474_v12 }
0x10db   :  { %vm1376_vm3 = vmor %vm1374_vm2, %vm1375_vm1  ;;  %vm1650_vm1 = vcmask 48128   ;;  %vm1652_vm2 = vcmask 56320  }
0x10dc   :  { %v1371_v15 = vsub.f32 1.0, %v1370_v43 }
0x10de   :  { %v1372_v17 = vmul.f32 %v2016_v4, %v1371_v15 }
0x10e0   :  { %v1373_v18 = vadd.f32 %v2016_v4, %v1372_v17 }
0x10e1   :  { %v891_v30 = vpop.f32.mrf.mxu1 }
0x10e2   :  { %v1377_v20 = vsel %vm1376_vm3, %v2016_v4, %v1373_v18  ;;  %v2691_v4 = vld [vmem:[%s2777_s8] ss:$0 sm:$0xff]  ;;  %s2195_s8 = smov 1   ;;  %vm1654_vm3 = vcmask 58368  }
0x10e3   :  { %v1382_v11 = vsel %vm1379_vm4, %v1381_v21, %v1377_v20  ;;  %v534_v51 = vadd.f32 %v2691_v4, %v533_v60  ;;  %v348_v15 = vadd.f32 %v2691_v4, %v347_v47 }
0x10e4   :  { %v1385_v24 = vmul.f32 %v1382_v11, %v2639_v7 }
0x10e9   :  { %v1066_v2 = vpop.f32.mrf.mxu1 }
0x10f1   :  { %v1245_v5 = vpop.f32.mrf.mxu1 }
0x10f2   :  { %v1246_v43 = vadd.f32 %v2691_v4, %v1245_v5 }
0x111f   :  { %v1483_v10 = vpop.permute.xlu2 %1482 }
0x1120   :  { %v1485_v14 = vmul.f32 %v1483_v10, %v1474_v12 }
0x1122   :  { %1487 = vrot.lane.b32.xlu1 %v1485_v14, %s2194_s3 }
0x1131   :  { %v1388_v63 = vpop.permute.xlu1 %1387 }
0x1132   :  { %v1390_v25 = vmul.f32 %v1388_v63, %v1382_v11 }
0x1134   :  { %1392 = vrot.lane.b32.xlu0 %v1390_v25, %s2194_s3 }
0x1194   :  { %v1488_v28 = vpop.permute.xlu1 %1487 }
0x1195   :  { %v1490_v33 = vadd.f32 %v1488_v28, %v1480_v13  ;;  %v713_v28 = vadd.f32 %v2691_v4, %v712_v0 }
0x1197   :  { %2017 = vtanh.f32 %v1490_v33  ;;  %v1067_v33 = vadd.f32 %v2691_v4, %v1066_v2 }
0x119d   :  { %v2018_v42 = vpop.eup %2017 }
0x119e   :  { %1493 = vrot.lane.b32.xlu0 %v2018_v42, %s2193_s2 }
0x11a6   :  { %v1393_v1 = vpop.permute.xlu0 %1392 }
0x11a7   :  { %v2670_v3 = vadd.f32 %v1393_v1, %v1385_v24 }
0x11a9   :  { %2019 = vtanh.f32 %v2670_v3 }
0x11af   :  { %v2020_v6 = vpop.eup %2019 }
0x11b0   :  { %1398 = vrot.lane.b32.xlu2 %v2020_v6, %s2193_s2 }
0x120a   :  { %v1399_v34 = vpop.permute.xlu2 %1398 }
0x120b   :  { %v2674_v26 = vmul.f32 %v1399_v34, %v1382_v11 }
0x120d   :  { %1403 = vrot.lane.b32.xlu1 %v2674_v26, %s2194_s3 }
0x1210   :  { %v1494_v16 = vpop.permute.xlu0 %1493 }
0x1211   :  { %v1496_v36 = vmul.f32 %v1494_v16, %v1474_v12  ;;  %v2698_v12 = vld [vmem:[%s2778_s9] ss:$0 sm:$0xff]  ;;  %s2196_s9 = smov 5  }
0x1213   :  { %v1518_v37 = vrot.slane %v1496_v36, 6 }
0x1215   :  { %1519 = vrot.lane.b32.xlu2 %v1518_v37, %s2194_s3 }
0x126f   :  { %v1520_v7 = vpop.permute.xlu2 %1519 }
0x1270   :  { %1856 = vmatmul.msk.f32.vlgmr.msrb.gmra.mxu0 %vm174_vm5, %v1520_v7 }
0x127f   :  { %v1404_v35 = vpop.permute.xlu1 %1403 }
0x1280   :  { %1852 = vmatmul.msk.f32.vlgmr.msrb.gmra.mxu1 %vm174_vm5, %v1404_v35  ;;  %1855 = vmatmul.msk.f32.vlgmr.msrb.gmra.mxu3 %vm174_vm5, %v1404_v35 }
0x12ed   :  { %v1540_v23 = vpop.f32.mrf.mxu0 }
0x12fd   :  { %v1424_v24 = vpop.f32.mrf.mxu1 }
0x12fe   :  { %v1425_v6 = vadd.f32 %v2691_v4, %v1424_v24 }
0x1303   :  { %v1514_v38 = vpop.f32.mrf.mxu3 }
0x1304   :  { %v1541_v40 = vadd.f32 %v1540_v23, %v1514_v38  ;;  %v1898_v38 = vld [vmem:[#allocation2] ss:$0 sm:$0xff] }
0x1306   :  { %v1543_v41 = vadd.f32 %v2659_v32, %v1541_v40 }
0x1308   :  { %2021 = vtanh.f32 %v1543_v41  ;;  %v1857_v48 = vmul.f32 -1.442695, %v1543_v41 }
0x130a   :  { %2023 = vpow2.f32 %v1857_v48 }
0x130e   :  { %v2022_v45 = vpop.eup %2021 }
0x130f   :  { %1566 = vrot.lane.b32.xlu0 %v2022_v45, %s2193_s2 }
0x1310   :  { %v2024_v52 = vpop.eup %2023 }
0x1311   :  { %v1547_v53 = vadd.f32 1.0, %v2024_v52 }
0x1313   :  { %2025 = vrcp.f32 %v1547_v53  ;;  %v1559_v55 = vand.u32 2147483648, %v1547_v53  ;;  %vm1553_vm7 = vweird.f32 %v1547_v53  ;;  %v1557_v56 = vand.u32 2147483647, %v1547_v53 }
0x1314   :  { %2027 = vtanh.f32 %v534_v51 }
0x1315   :  { %v1560_v58 = vor.u32 1.1754944e-38, %v1559_v55  ;;  %vm1558_vm9 = vcmp.eq.f32.partialorder %v1557_v56, 8.507059e+37  ;;  %2029 = vtanh.f32 %v1246_v43 }
0x1316   :  { %2031 = vtanh.f32 %v348_v15 }
0x1319   :  { %v2026_v46 = vpop.eup %2025 }
0x131a   :  { %v1549_v54 = vmul.f32 %v2026_v46, %v1547_v53  ;;  %vm1554_vm6 = vweird.f32 %v2026_v46  ;;  %v2028_v10 = vpop.eup %2027  ;;  %v892_v53 = vadd.f32 %v2691_v4, %v891_v30 }
0x131b   :  { %vm1555_vm8 = vmor %vm1553_vm7, %vm1554_vm6  ;;  %v537_v14 = vmul.f32 %v2028_v10, %v2698_v12  ;;  %v2030_v18 = vpop.eup %2029 }
0x131c   :  { %v1550_v9 = vsub.f32 1.0, %v1549_v54  ;;  %v1249_v59 = vmul.f32 %v2030_v18, %v2698_v12  ;;  %v2032_v20 = vpop.eup %2031 }
0x131d   :  { %v538_v17 = vsel %vm355_vm10, %v537_v14, 0.0  ;;  %v354_v21 = vmul.f32 %v2032_v20, %v2698_v12 }
0x131e   :  { %v1551_v57 = vmul.f32 %v2026_v46, %v1550_v9  ;;  %v1250_v19 = vsel %vm355_vm10, %v1249_v59, 0.0 }
0x131f   :  { %v356_v63 = vsel %vm355_vm10, %v354_v21, 0.0 }
0x1320   :  { %v1552_v49 = vadd.f32 %v2026_v46, %v1551_v57 }
0x1322   :  { %v1556_v32 = vsel %vm1555_vm8, %v2026_v46, %v1552_v49 }
0x1323   :  { %v2684_v62 = vsel %vm1558_vm9, %v1560_v58, %v1556_v32 }
0x1324   :  { %v1564_v11 = vmul.f32 %v2684_v62, %v2670_v3 }
0x1381   :  { %v1567_v61 = vpop.permute.xlu0 %1566 }
0x1382   :  { %v1569_v27 = vmul.f32 %v1567_v61, %v2684_v62 }
0x1384   :  { %1571 = vrot.lane.b32.xlu1 %v1569_v27, %s2194_s3 }
0x13ae   :  { %539 = vadd.xlane.f32.xlu1 %v538_v17 }
0x13b6   :  { %1251 = vadd.xlane.f32.xlu1 %v1250_v19 }
0x13be   :  { %357 = vadd.xlane.f32.xlu1 %v356_v63 }
0x13f6   :  { %v1572_v25 = vpop.permute.xlu1 %1571 }
0x13f7   :  { %v1574_v29 = vadd.f32 %v1572_v25, %v1564_v11 }
0x13f9   :  { %2033 = vtanh.f32 %v1574_v29 }
0x13fa   :  { %2035 = vtanh.f32 %v713_v28 }
0x13fb   :  { %2037 = vtanh.f32 %v1067_v33 }
0x13fc   :  { %2039 = vtanh.f32 %v1425_v6  ;;  %v2202_v6 = vmov 4  }
0x13fd   :  { %2041 = vtanh.f32 %v892_v53  ;;  %1890 = vset.pattern.permute.xlu1 %v2202_v6 }
0x13ff   :  { %v2034_v13 = vpop.eup %2033 }
0x1400   :  { %1577 = vrot.lane.b32.xlu2 %v2034_v13, %s2193_s2  ;;  %v2036_v42 = vpop.eup %2035 }
0x1401   :  { %v716_v1 = vmul.f32 %v2036_v42, %v2698_v12  ;;  %v2038_v34 = vpop.eup %2037 }
0x1402   :  { %v1070_v16 = vmul.f32 %v2038_v34, %v2698_v12  ;;  %v2040_v37 = vpop.eup %2039  ;;  %v2204_v34 = vmov 0  }
0x1403   :  { %v717_v3 = vsel %vm355_vm10, %v716_v1, 0.0  ;;  %v1428_v7 = vmul.f32 %v2040_v37, %v2698_v12  ;;  %v2042_v46 = vpop.eup %2041  ;;  %1886 = vset.pattern.permute.xlu0 %v2204_v34 }
0x1404   :  { %v1071_v36 = vsel %vm355_vm10, %v1070_v16, 0.0  ;;  %v895_v54 = vmul.f32 %v2042_v46, %v2698_v12  ;;  %v2205_v46 = vmov 6  }
0x1405   :  { %v1429_v35 = vsel %vm355_vm10, %v1428_v7, 0.0 }
0x1406   :  { %v896_v9 = vsel %vm355_vm10, %v895_v54, 0.0  ;;  %v2206_v54 = vmov 1  }
0x1421   :  { %v540_v23 = vpop.xlane.xlu1 %539 }
0x1422   :  { %v541_v40 = vadd.f32 %v1898_v38, %v540_v23 }
0x1429   :  { %718 = vadd.xlane.f32.xlu2 %v717_v3  ;;  %v1252_v41 = vpop.xlane.xlu1 %1251  ;;  %v2203_v3 = vmov 3  }
0x142a   :  { %v1253_v45 = vadd.f32 %v1898_v38, %v1252_v41  ;;  %1889 = vset.pattern.permute.xlu2 %v2203_v3 }
0x1431   :  { %1072 = vadd.xlane.f32.xlu2 %v1071_v36  ;;  %v358_v14 = vpop.xlane.xlu1 %357 }
0x1432   :  { %v362_v18 = vadd.f32 %v1898_v38, %v358_v14 }
0x1439   :  { %1430 = vadd.xlane.f32.xlu2 %v1429_v35 }
0x1451   :  { %1613 = vrot.lane.b32.xlu2 %v541_v40, %s2195_s8 }
0x1459   :  { %1629 = vrot.lane.b32.xlu2 %v1253_v45, %s2196_s9 }
0x145a   :  { %v1578_v48 = vpop.permute.xlu2 %1577 }
0x145b   :  { %v2720_v52 = vmul.f32 %v1578_v48, %v2684_v62 }
0x145d   :  { %1582 = vrot.lane.b32.xlu0 %v2720_v52, %s2194_s3 }
0x1487   :  { %897 = vadd.xlane.f32.xlu0 %v896_v9  ;;  %v2207_v9 = vmov 2  }
0x149c   :  { %v719_v57 = vpop.xlane.xlu2 %718 }
0x149d   :  { %v720_v47 = vadd.f32 %v1898_v38, %v719_v57  ;;  %v2208_v57 = vmov 5  }
0x149f   :  { %1617 = vrot.lane.b32.xlu0 %v720_v47, %s2197_s5  ;;  %v2209_v47 = vmov 7  }
0x14a4   :  { %v1073_v49 = vpop.xlane.xlu2 %1072 }
0x14a5   :  { %v1074_v55 = vadd.f32 %v1898_v38, %v1073_v49 }
0x14a7   :  { %1625 = vrot.lane.b32.xlu0 %v1074_v55, %s2198_s24 }
0x14ac   :  { %v1431_v60 = vpop.xlane.xlu2 %1430 }
0x14ad   :  { %v1432_v61 = vadd.f32 %v1898_v38, %v1431_v60  ;;  %v1727_v60 = vld [vmem:[%s2780_s11] sm:$0xff] }
0x14b4   :  { %v1614_v17 = vpop.permute.xlu2 %1613 }
0x14bc   :  { %v1630_v21 = vpop.permute.xlu2 %1629 }
0x14cf   :  { %v1583_v56 = vpop.permute.xlu0 %1582 }
0x14d0   :  { %1858 = vmatmul.msk.f32.vlgmr.msra.gmra.mxu1 %vm174_vm5, %v1583_v56  ;;  %v1730_v56 = vld [vmem:[%s2780_s11 + $0x18] sm:$0xff] }
0x14d1   :  { %1752 = vmatpush.msra.mxu2 %v1730_v56 }
0x14fa   :  { %v898_v32 = vpop.xlane.xlu0 %897 }
0x14fb   :  { %v899_v58 = vadd.f32 %v1898_v38, %v898_v32  ;;  %v1729_v32 = vld [vmem:[%s2780_s11 + $0x10] sm:$0xff] }
0x14fc   :  { %1753 = vmatpush.msra.mxu2 %v1729_v32 }
0x14fd   :  { %1621 = vrot.lane.b32.xlu1 %v899_v58, %s2199_s7  ;;  %v1728_v58 = vld [vmem:[%s2780_s11 + $0x8] sm:$0xff] }
0x14fe   :  { %1754 = vmatpush.msra.mxu2 %v1728_v58 }
0x1500   :  { %1755 = vmatpush.msra.mxu2 %v1727_v60 }
0x1505   :  { %1633 = vrot.lane.b32.xlu1 %v1432_v61, %s2200_s25 }
0x1511   :  { %v1618_v51 = vpop.permute.xlu0 %1617 }
0x1519   :  { %v1626_v5 = vpop.permute.xlu0 %1625 }
0x154d   :  { %v1603_v62 = vpop.f32.mrf.mxu1 }
0x154e   :  { %v1604_v27 = vadd.f32 %v2691_v4, %v1603_v62  ;;  %v1641_v4 = vsel %vm1640_vm11, %v362_v18, %v1614_v17 }
0x154f   :  { %v1643_v59 = vsel %vm1642_vm12, %v1641_v4, %v1618_v51 }
0x1550   :  { %2043 = vtanh.f32 %v1604_v27 }
0x1556   :  { %v2044_v0 = vpop.eup %2043 }
0x1557   :  { %v1607_v30 = vmul.f32 %v2044_v0, %v2698_v12 }
0x1559   :  { %v1608_v2 = vsel %vm355_vm10, %v1607_v30, 0.0 }
0x155a   :  { %1609 = vadd.xlane.f32.xlu0 %v1608_v2 }
0x156f   :  { %v1622_v15 = vpop.permute.xlu1 %1621 }
0x1570   :  { %v1645_v12 = vsel %vm1644_vm13, %v1643_v59, %v1622_v15 }
0x1571   :  { %v1647_v19 = vsel %vm1646_vm14, %v1645_v12, %v1626_v5 }
0x1572   :  { %v1649_v63 = vsel %vm1648_vm15, %v1647_v19, %v1630_v21 }
0x1577   :  { %v1634_v20 = vpop.permute.xlu1 %1633 }
0x1578   :  { %v1651_v11 = vsel %vm1650_vm1, %v1649_v63, %v1634_v20  ;;  %v1900_v63 = vld [vmem:[%s2783_s14] ss:$0 sm:$0xff] }
0x15cd   :  { %v1610_v43 = vpop.xlane.xlu0 %1609 }
0x15ce   :  { %v1611_v10 = vadd.f32 %v1898_v38, %v1610_v43 }
0x15d0   :  { %1637 = vrot.lane.b32.xlu0 %v1611_v10, %s2201_s26 }
0x1642   :  { %v1638_v25 = vpop.permute.xlu0 %1637 }
0x1643   :  { %v1653_v29 = vsel %vm1652_vm2, %v1651_v11, %v1638_v25 }
0x1644   :  { %v1655_v13 = vsel %vm1654_vm3, %v1653_v29, -inf }
0x1645   :  { %1656 = vmax.xlane.f32.xlu2 %v1655_v13 }
0x16b8   :  { %v1657_v28 = vpop.xlane.xlu2 %1656 }
0x16b9   :  { %v1658_v33 = vsub.f32 %v1653_v29, %v1657_v28 }
0x16bb   :  { %v1659_v42 = vmul.f32 1.442695, %v1658_v33 }
0x16bd   :  { %2045 = vpow2.f32 %v1659_v42 }
0x16c3   :  { %v2046_v24 = vpop.eup %2045 }
0x16c4   :  { %v1661_v1 = vsel %vm1654_vm3, %v2046_v24, 0.0 }
0x16c5   :  { %1662 = vadd.xlane.f32.xlu1 %v1661_v1 }
0x1738   :  { %v1663_v16 = vpop.xlane.xlu1 %1662 }
0x1739   :  { %2047 = vrcp.f32 %v1663_v16  ;;  %v1675_v35 = vand.u32 2147483648, %v1663_v16  ;;  %v1673_v38 = vand.u32 2147483647, %v1663_v16  ;;  %vm1669_vm6 = vweird.f32 %v1663_v16 }
0x173b   :  { %v1676_v41 = vor.u32 1.1754944e-38, %v1675_v35  ;;  %vm1674_vm8 = vcmp.eq.f32.partialorder %v1673_v38, 8.507059e+37 }
0x173f   :  { %v2048_v36 = vpop.eup %2047 }
0x1740   :  { %v1665_v37 = vmul.f32 %v2048_v36, %v1663_v16  ;;  %vm1670_vm4 = vweird.f32 %v2048_v36 }
0x1741   :  { %vm1671_vm7 = vmor %vm1669_vm6, %vm1670_vm4 }
0x1742   :  { %v1666_v7 = vsub.f32 1.0, %v1665_v37 }
0x1744   :  { %v1667_v23 = vmul.f32 %v2048_v36, %v1666_v7 }
0x1746   :  { %v1668_v40 = vadd.f32 %v2048_v36, %v1667_v23 }
0x1748   :  { %v1672_v45 = vsel %vm1671_vm7, %v2048_v36, %v1668_v40 }
0x1749   :  { %v1677_v48 = vsel %vm1674_vm8, %v1676_v41, %v1672_v45 }
0x174a   :  { %v1678_v53 = vmul.f32 %v2046_v24, %v1677_v48 }
0x174c   :  { %1704 = vperm.xlu1 %1890, %v1678_v53   ;;  %1698 = vperm.xlu2 %1889, %v1678_v53  }
0x174d   :  { %1681 = vperm.xlu0 %1886, %v1678_v53  }
0x1754   :  { %1892 = vset.pattern.permute.xlu2 %v2205_v46 }
0x1755   :  { %1887 = vset.pattern.permute.xlu0 %v2206_v54  ;;  %1716 = vperm.xlu2 %1892, %v1678_v53  }
0x1756   :  { %1686 = vperm.xlu0 %1887, %v1678_v53  }
0x175e   :  { %1888 = vset.pattern.permute.xlu0 %v2207_v9 }
0x175f   :  { %1692 = vperm.xlu0 %1888, %v1678_v53  }
0x1767   :  { %1891 = vset.pattern.permute.xlu0 %v2208_v57 }
0x1768   :  { %1710 = vperm.xlu0 %1891, %v1678_v53  }
0x1770   :  { %1893 = vset.pattern.permute.xlu0 %v2209_v47 }
0x1771   :  { %1722 = vperm.xlu0 %1893, %v1678_v53  }
0x17a6   :  { %v1699_v2 = vpop.permute.xlu2 %1698 }
0x17a7   :  { %v1701_v5 = vmul.f32 %v1699_v2, %v2573_v31  ;;  %v1762_v31 = vld [vmem:[%s2782_s13 + $0x8] sm:$0xff] }
0x17a8   :  { %1784 = vmatpush.msra.mxu3 %v1762_v31 }
0x17af   :  { %v1717_v4 = vpop.permute.xlu2 %1716 }
0x17b0   :  { %v1719_v59 = vmul.f32 %v1717_v4, %v2674_v26  ;;  %v1899_v26 = vld [vmem:[%s2781_s12] ss:$0 sm:$0xff] }
0x17be   :  { %v1705_v43 = vpop.permute.xlu1 %1704 }
0x17bf   :  { %v1682_v49 = vpop.permute.xlu0 %1681  ;;  %v1707_v15 = vmul.f32 %v1705_v43, %v2615_v44 }
0x17c0   :  { %v1684_v27 = vmul.f32 %v1682_v49, %v2432_v50 }
0x17c8   :  { %v1687_v55 = vpop.permute.xlu0 %1686 }
0x17c9   :  { %v1689_v61 = vmul.f32 %v1687_v55, %v2488_v8 }
0x17cb   :  { %v1690_v30 = vadd.f32 %v1689_v61, %v1684_v27 }
0x17d1   :  { %v1693_v62 = vpop.permute.xlu0 %1692 }
0x17d2   :  { %v1695_v0 = vmul.f32 %v1693_v62, %v2528_v22 }
0x17d4   :  { %v1696_v51 = vadd.f32 %v1695_v0, %v1690_v30 }
0x17d6   :  { %v1702_v10 = vadd.f32 %v1701_v5, %v1696_v51 }
0x17d8   :  { %v1708_v18 = vadd.f32 %v1707_v15, %v1702_v10 }
0x17da   :  { %v1711_v14 = vpop.permute.xlu0 %1710 }
0x17db   :  { %v1713_v17 = vmul.f32 %v1711_v14, %v2644_v39  ;;  %v1761_v39 = vld [vmem:[%s2782_s13] sm:$0xff]  ;;  %s1799_s13 = sshll.u32 %s2784_s15, 4  ;;  %s1800_s13 = int_to_ptr.hbm [resolvable:$true] %s1799_s13 }
0x17dc   :  { %1785 = vmatpush.msra.mxu3 %v1761_v39 }
0x17dd   :  { %v1714_v8 = vadd.f32 %v1713_v17, %v1708_v18 }
0x17df   :  { %v1720_v12 = vadd.f32 %v1719_v59, %v1714_v8 }
0x17e3   :  { %v1723_v50 = vpop.permute.xlu0 %1722 }
0x17e4   :  { %v1725_v22 = vmul.f32 %v1723_v50, %v2720_v52 }
0x17e6   :  { %v1726_v19 = vadd.f32 %v1725_v22, %v1720_v12 }
0x17e8   :  { %1736 = vrot.lane.b32.xlu1 %v1726_v19, %s2194_s3 }
0x185a   :  { %v1737_v44 = vpop.permute.xlu1 %1736 }
0x185b   :  { %1859 = vmatmul.msk.f32.vlgmr.msra.gmra.mxu2 %vm174_vm5, %v1737_v44  ;;  %vm1790_vm5 = vcmask 17408  }
0x18de   :  { %v1757_v52 = vpop.f32.mrf.mxu2 }
0x18df   :  { %v1758_v20 = vadd.f32 %v1899_v26, %v1757_v52 }
0x18e1   :  { %v1760_v21 = vmax.f32 %v1758_v20, 0.0 }
0x18e3   :  { %1860 = vmatmul.msk.f32.vlgmr.msra.gmra.mxu3 %vm144_vm0, %v1760_v21 }
0x1966   :  { %v1787_v11 = vpop.f32.mrf.mxu3 }
0x1967   :  { %v1788_v25 = vadd.f32 %v1900_v63, %v1787_v11 }
0x1969   :  { %1791 = vst.msk [vmem:[#allocation11] sm:$0x3] %vm1790_vm5, %v1788_v25 }
0x196a   :  { %1802 = dma.vmem_to_hbm [thread:$0]  %s1798_s23, 32, %s1800_s13, [#allocation5]  }
0x196b   :  { %2184 = dma.done.wait [#allocation5], 32  }
0x196c   :  { %2185 = vsyncadd [#allocation5], 4294967264 }
0x196d   :  { %1807 = vsyncpa [#allocation4], 1 }
0x196e   :  { %1808 = vsyncpa [#allocation7], 1 }
0x196f   :  { %1809 = vsyncpa [#allocation10], 1 }
0x1970   :  { %1810 = vsyncpa [#allocation5], 1 }

</bundles_post_ra>
